<compile_context>
chip_gen: v5e
topology: v5e:2x2
jax: 0.10.0
libtpu: 0.0.40
codegen_flags: <defaults>
</compile_context>

<pallas_src>
import jax
import jax.numpy as jnp
from jax import lax
from jax.experimental import pallas as pl
from jax.experimental.pallas import tpu as pltpu


# ---------------------------------------------------------------------------
# Helpers
# ---------------------------------------------------------------------------
def _round_up(n, m):
    return ((n + m - 1) // m) * m


# ---------------------------------------------------------------------------
# Fused kernel
# ---------------------------------------------------------------------------
def _make_fused_mlp_kernel(num_hidden, compute_dtype):
    """Build a fused kernel: num_hidden x (Linear+ReLU) then Linear+log_softmax."""

    def kernel(x_ref, *refs):
        # refs layout: w0, b0, ..., w_{h-1}, b_{h-1}, w_out, b_out, o_ref
        o_ref = refs[-1]
        params = refs[:-1]

        # Activation tile rides in vregs; MXU sees `compute_dtype` inputs with
        # f32 accumulation, epilogues (bias/ReLU/log_softmax) stay in f32.
        h = x_ref[...]  # already compute_dtype (cast at the kernel boundary)
        for i in range(num_hidden):
            w = params[2 * i]
            b = params[2 * i + 1]
            acc = jnp.dot(h, w[...], preferred_element_type=jnp.float32)
            acc = acc + b[...]                      # (1, H) f32 broadcast
            h = jnp.maximum(acc, 0.0).astype(compute_dtype)

        w_out = params[-2]
        b_out = params[-1]
        logits = jnp.dot(h, w_out[...], preferred_element_type=jnp.float32)
        logits = logits + b_out[...]

        # Numerically stable log_softmax over the class axis (f32, EUP exp/log).
        m = jnp.max(logits, axis=-1, keepdims=True)
        z = logits - m
        lse = jnp.log(jnp.sum(jnp.exp(z), axis=-1, keepdims=True))
        o_ref[...] = (z - lse).astype(o_ref.dtype)

    return kernel


# ---------------------------------------------------------------------------
# Wrapper (matches Mlp.forward semantics)
# ---------------------------------------------------------------------------
def mlp_forward(x, params, input_dimension, *, block_batch=512,
                compute_dtype=jnp.bfloat16, out_dtype=jnp.bfloat16):
    hidden_params, (w_out, b_out) = params
    x2 = x.reshape(-1, input_dimension)                      # x.view(-1, D_in)
    batch = x2.shape[0]
    out_dim = w_out.shape[1]

    # Batch tile: multiple of 16 (bf16 packs 2 rows/sublane), capped at
    # block_batch. Prefer >= 2 grid steps when the batch allows it (v7x has
    # two TensorCores; grid=(1,) leaves one idle).
    block_batch = max(16, _round_up(block_batch, 16))
    tb = min(block_batch, _round_up(batch, 16))
    if _round_up(batch, tb) // tb < 2 and batch >= 32:
        tb = _round_up(pl.cdiv(batch, 2), 16)
    assert tb % 16 == 0

    padded = _round_up(batch, tb)
    if padded != batch:
        x2 = jnp.pad(x2, ((0, padded - batch), (0, 0)))

    # bf16 MXU inputs (halves activation/weight DMA bytes); biases stay f32.
    x2 = x2.astype(compute_dtype)
    flat = []
    for (w, b) in hidden_params:
        flat.extend([w.astype(compute_dtype), b.astype(jnp.float32)])
    flat.extend([w_out.astype(compute_dtype), b_out.astype(jnp.float32)])

    vmem = pltpu.MemorySpace.VMEM
    grid = (padded // tb,)

    # Activation tile walks the batch; weights/biases are VMEM-resident
    # (constant index_map -> fetched once, reused every grid step).
    in_specs = [pl.BlockSpec((tb, input_dimension), lambda i: (i, 0),
                             memory_space=vmem)]
    for a in flat:
        in_specs.append(pl.BlockSpec(a.shape, lambda i: (0, 0),
                                     memory_space=vmem))
    out_specs = pl.BlockSpec((tb, out_dim), lambda i: (i, 0), memory_space=vmem)

    # Advisory cost estimate for the fused call.
    dims = [input_dimension] + [w.shape[1] for (w, _) in hidden_params] + [out_dim]
    flops = 2 * padded * sum(dims[i] * dims[i + 1] for i in range(len(dims) - 1))
    transcendentals = padded * (out_dim + 1)                # exp + log per row
    out_itemsize = jnp.dtype(out_dtype).itemsize
    bytes_accessed = int(
        x2.size * x2.dtype.itemsize
        + sum(a.size * a.dtype.itemsize for a in flat)
        + padded * out_dim * out_itemsize)

    kernel = _make_fused_mlp_kernel(len(hidden_params), compute_dtype)

    out = pl.pallas_call(
        kernel,
        out_shape=jax.ShapeDtypeStruct((padded, out_dim), out_dtype),
        grid=grid,
        in_specs=in_specs,
        out_specs=out_specs,
        compiler_params=pltpu.CompilerParams(
            dimension_semantics=("parallel",),
            # Explicit budget: needs < 1 MiB here; 48 MiB keeps headroom while
            # staying below v7x's 64 MiB physical VMEM (v5e/v6e have 128 MiB).
            vmem_limit_bytes=48 * 1024 * 1024),
        cost_estimate=pl.CostEstimate(
            flops=flops,
            transcendentals=transcendentals,
            bytes_accessed=bytes_accessed),
    )(x2, *flat)
    return out[:batch]


# ---------------------------------------------------------------------------
# Parameter init (shapes mirror the nn.Linear stack)
# ---------------------------------------------------------------------------
def init_mlp_params(key, input_dimension, output_dimension, hidden_dims):
    hidden_params = []
    prev = input_dimension
    for dim in hidden_dims:
        key, kw, kb = jax.random.split(key, 3)
        bound = 1.0 / jnp.sqrt(prev)
        w = jax.random.uniform(kw, (prev, dim), jnp.float32, -bound, bound)
        b = jax.random.uniform(kb, (1, dim), jnp.float32, -bound, bound)
        hidden_params.append((w, b))
        prev = dim
    key, kw, kb = jax.random.split(key, 3)
    bound = 1.0 / jnp.sqrt(prev)
    w_out = jax.random.uniform(kw, (prev, output_dimension), jnp.float32, -bound, bound)
    b_out = jax.random.uniform(kb, (1, output_dimension), jnp.float32, -bound, bound)
    return hidden_params, (w_out, b_out)


# ---------------------------------------------------------------------------
# References (for correctness checking only)
# ---------------------------------------------------------------------------
def ref_forward_mixed(x, params, input_dimension, compute_dtype):
    """Mirrors the kernel's bf16-input / f32-accumulate numerics."""
    hidden_params, (w_out, b_out) = params
    h = x.reshape(-1, input_dimension).astype(compute_dtype).astype(jnp.float32)
    for (w, b) in hidden_params:
        wq = w.astype(compute_dtype).astype(jnp.float32)
        h = jnp.maximum(jnp.dot(h, wq, precision=lax.Precision.HIGHEST) + b, 0.0)
        h = h.astype(compute_dtype).astype(jnp.float32)
    wq = w_out.astype(compute_dtype).astype(jnp.float32)
    logits = jnp.dot(h, wq, precision=lax.Precision.HIGHEST) + b_out
    return jax.nn.log_softmax(logits, axis=1)


def ref_forward_f32(x, params, input_dimension):
    hidden_params, (w_out, b_out) = params
    h = x.reshape(-1, input_dimension)
    for (w, b) in hidden_params:
        h = jnp.maximum(jnp.dot(h, w, precision=lax.Precision.HIGHEST) + b, 0.0)
    logits = jnp.dot(h, w_out, precision=lax.Precision.HIGHEST) + b_out
    return jax.nn.log_softmax(logits, axis=1)


# ---------------------------------------------------------------------------
# Main
# ---------------------------------------------------------------------------
if __name__ == "__main__":
    key = jax.random.PRNGKey(0)

    input_dimension = 64
    output_dimension = 16
    hidden_dims = [128, 64]

    key, kx, kp = jax.random.split(key, 3)
    # Arbitrary leading shape; forward flattens with view(-1, input_dimension):
    # (16, 64, 64) -> 1024 rows of 64 features. With block_batch=256 the grid
    # has 4 steps (amortizes per-step overhead, feeds both v7x TensorCores).
    x = jax.random.normal(kx, (16, 64, input_dimension), jnp.float32)
    params = init_mlp_params(kp, input_dimension, output_dimension, hidden_dims)

    flat_batch = x.size // input_dimension

    # Performance-default path: bf16 output (halves the HBM write stream).
    out_bf16 = mlp_forward(x, params, input_dimension, block_batch=256,
                           out_dtype=jnp.bfloat16)
    # f32-output path (same kernel) for a strict numerical check.
    out_f32 = mlp_forward(x, params, input_dimension, block_batch=256,
                          out_dtype=jnp.float32)
    jax.block_until_ready((out_bf16, out_f32))

    assert out_bf16.shape == (flat_batch, output_dimension)
    assert out_f32.shape == (flat_batch, output_dimension)

    # Strict check vs a reference with identical (bf16-in, f32-acc) numerics.
    ref_m = ref_forward_mixed(x, params, input_dimension, jnp.bfloat16)
    assert jnp.allclose(out_f32, ref_m, atol=5e-3, rtol=5e-3)
    # bf16 output: allow one bf16 ulp of extra rounding on the log-probs.
    assert jnp.allclose(out_bf16.astype(jnp.float32), ref_m, atol=6e-2, rtol=2e-2)

    # Loose sanity check vs the full-f32 PyTorch-equivalent forward.
    ref_f = ref_forward_f32(x, params, input_dimension)
    assert jnp.allclose(out_f32, ref_f, atol=1e-1, rtol=1e-1)

    print("KERNEL_OK")
</pallas_src>

<mosaic_0001>
module attributes {stable_mosaic.version = 11 : i64} {
  func.func @kernel(%arg0: i32, %arg1: memref<256x64xbf16, #tpu.memory_space<vmem>>, %arg2: memref<64x128xbf16, #tpu.memory_space<vmem>>, %arg3: memref<1x128xf32, #tpu.memory_space<vmem>>, %arg4: memref<128x64xbf16, #tpu.memory_space<vmem>>, %arg5: memref<1x64xf32, #tpu.memory_space<vmem>>, %arg6: memref<64x16xbf16, #tpu.memory_space<vmem>>, %arg7: memref<1x16xf32, #tpu.memory_space<vmem>>, %arg8: memref<256x16xbf16, #tpu.memory_space<vmem>>) attributes {dimension_semantics = [#tpu.dimension_semantics<parallel>], iteration_bounds = array<i64: 4>, scalar_prefetch = 0 : i64, scratch_operands = 0 : i64, tpu.core_type = #tpu.core_type<tc>, window_params = [{transform_indices = @transform_0, window_bounds = array<i64: 256, 64>}, {pipeline_mode = #tpu.pipeline_mode<synchronous>, transform_indices = @transform_1, window_bounds = array<i64: 64, 128>}, {pipeline_mode = #tpu.pipeline_mode<synchronous>, transform_indices = @transform_2, window_bounds = array<i64: 1, 128>}, {pipeline_mode = #tpu.pipeline_mode<synchronous>, transform_indices = @transform_3, window_bounds = array<i64: 128, 64>}, {pipeline_mode = #tpu.pipeline_mode<synchronous>, transform_indices = @transform_4, window_bounds = array<i64: 1, 64>}, {pipeline_mode = #tpu.pipeline_mode<synchronous>, transform_indices = @transform_5, window_bounds = array<i64: 64, 16>}, {pipeline_mode = #tpu.pipeline_mode<synchronous>, transform_indices = @transform_6, window_bounds = array<i64: 1, 16>}, {transform_indices = @transform_7, window_bounds = array<i64: 256, 16>}]} {
    %c0 = arith.constant 0 : index
    %c0_0 = arith.constant 0 : index
    %0 = vector.load %arg1[%c0, %c0_0] : memref<256x64xbf16, #tpu.memory_space<vmem>>, vector<256x64xbf16>
    %c0_1 = arith.constant 0 : index
    %c0_2 = arith.constant 0 : index
    %1 = vector.load %arg2[%c0_1, %c0_2] : memref<64x128xbf16, #tpu.memory_space<vmem>>, vector<64x128xbf16>
    %cst = arith.constant dense<0.000000e+00> : vector<256x128xf32>
    %2 = tpu.matmul %0, %1, %cst {dimension_numbers = #tpu.dot_dimension_numbers<[1], [0], [0], [1], [0, 0, 1, 1], [], []>} : vector<256x64xbf16>, vector<64x128xbf16>, vector<256x128xf32> -> vector<256x128xf32>
    %c0_3 = arith.constant 0 : index
    %c0_4 = arith.constant 0 : index
    %3 = vector.load %arg3[%c0_3, %c0_4] : memref<1x128xf32, #tpu.memory_space<vmem>>, vector<1x128xf32>
    %4 = vector.broadcast %3 : vector<1x128xf32> to vector<256x128xf32>
    %5 = arith.addf %2, %4 : vector<256x128xf32>
    %cst_5 = arith.constant 0.000000e+00 : f32
    %6 = vector.broadcast %cst_5 : f32 to vector<256x128xf32>
    %7 = arith.maximumf %5, %6 : vector<256x128xf32>
    %8 = arith.truncf %7 : vector<256x128xf32> to vector<256x128xbf16>
    %c0_6 = arith.constant 0 : index
    %c0_7 = arith.constant 0 : index
    %9 = vector.load %arg4[%c0_6, %c0_7] : memref<128x64xbf16, #tpu.memory_space<vmem>>, vector<128x64xbf16>
    %cst_8 = arith.constant dense<0.000000e+00> : vector<256x64xf32>
    %10 = tpu.matmul %8, %9, %cst_8 {dimension_numbers = #tpu.dot_dimension_numbers<[1], [0], [0], [1], [0, 0, 1, 1], [], []>} : vector<256x128xbf16>, vector<128x64xbf16>, vector<256x64xf32> -> vector<256x64xf32>
    %c0_9 = arith.constant 0 : index
    %c0_10 = arith.constant 0 : index
    %11 = vector.load %arg5[%c0_9, %c0_10] : memref<1x64xf32, #tpu.memory_space<vmem>>, vector<1x64xf32>
    %12 = vector.broadcast %11 : vector<1x64xf32> to vector<256x64xf32>
    %13 = arith.addf %10, %12 : vector<256x64xf32>
    %cst_11 = arith.constant 0.000000e+00 : f32
    %14 = vector.broadcast %cst_11 : f32 to vector<256x64xf32>
    %15 = arith.maximumf %13, %14 : vector<256x64xf32>
    %16 = arith.truncf %15 : vector<256x64xf32> to vector<256x64xbf16>
    %c0_12 = arith.constant 0 : index
    %c0_13 = arith.constant 0 : index
    %17 = vector.load %arg6[%c0_12, %c0_13] : memref<64x16xbf16, #tpu.memory_space<vmem>>, vector<64x16xbf16>
    %cst_14 = arith.constant dense<0.000000e+00> : vector<256x16xf32>
    %18 = tpu.matmul %16, %17, %cst_14 {dimension_numbers = #tpu.dot_dimension_numbers<[1], [0], [0], [1], [0, 0, 1, 1], [], []>} : vector<256x64xbf16>, vector<64x16xbf16>, vector<256x16xf32> -> vector<256x16xf32>
    %c0_15 = arith.constant 0 : index
    %c0_16 = arith.constant 0 : index
    %19 = vector.load %arg7[%c0_15, %c0_16] : memref<1x16xf32, #tpu.memory_space<vmem>>, vector<1x16xf32>
    %20 = vector.broadcast %19 : vector<1x16xf32> to vector<256x16xf32>
    %21 = arith.addf %18, %20 : vector<256x16xf32>
    %cst_17 = arith.constant dense<0xFF800000> : vector<256xf32>
    %22 = vector.multi_reduction <maximumf>, %21, %cst_17 [1] : vector<256x16xf32> to vector<256xf32>
    %23 = vector.shape_cast %22 : vector<256xf32> to vector<256x1xf32>
    %24 = vector.broadcast %23 : vector<256x1xf32> to vector<256x16xf32>
    %25 = arith.subf %21, %24 : vector<256x16xf32>
    %26 = math.exp %25 : vector<256x16xf32>
    %cst_18 = arith.constant dense<0.000000e+00> : vector<256xf32>
    %27 = vector.multi_reduction <add>, %26, %cst_18 [1] : vector<256x16xf32> to vector<256xf32>
    %28 = vector.shape_cast %27 : vector<256xf32> to vector<256x1xf32>
    %29 = math.log %28 : vector<256x1xf32>
    %30 = vector.broadcast %29 : vector<256x1xf32> to vector<256x16xf32>
    %31 = arith.subf %25, %30 : vector<256x16xf32>
    %32 = arith.truncf %31 : vector<256x16xf32> to vector<256x16xbf16>
    %c0_19 = arith.constant 0 : index
    %c0_20 = arith.constant 0 : index
    %33 = vector.load %arg8[%c0_19, %c0_20] : memref<256x16xbf16, #tpu.memory_space<vmem>>, vector<256x16xbf16>
    tpu.vector_store %arg8[%c0_19, %c0_20], %32 {strides = array<i32>} : memref<256x16xbf16, #tpu.memory_space<vmem>>, vector<256x16xbf16>,
    return
  }
  func.func @transform_0(%arg0: i32) -> (i32, i32) {
    %c0_i32 = arith.constant 0 : i32
    %c0_i32_0 = arith.constant 0 : i32
    return %arg0, %c0_i32 : i32, i32
  }
  func.func @transform_1(%arg0: i32) -> (i32, i32) {
    %c0_i32 = arith.constant 0 : i32
    %c0_i32_0 = arith.constant 0 : i32
    %c0_i32_1 = arith.constant 0 : i32
    return %c0_i32, %c0_i32_0 : i32, i32
  }
  func.func @transform_2(%arg0: i32) -> (i32, i32) {
    %c0_i32 = arith.constant 0 : i32
    %c0_i32_0 = arith.constant 0 : i32
    %c0_i32_1 = arith.constant 0 : i32
    return %c0_i32, %c0_i32_0 : i32, i32
  }
  func.func @transform_3(%arg0: i32) -> (i32, i32) {
    %c0_i32 = arith.constant 0 : i32
    %c0_i32_0 = arith.constant 0 : i32
    %c0_i32_1 = arith.constant 0 : i32
    return %c0_i32, %c0_i32_0 : i32, i32
  }
  func.func @transform_4(%arg0: i32) -> (i32, i32) {
    %c0_i32 = arith.constant 0 : i32
    %c0_i32_0 = arith.constant 0 : i32
    %c0_i32_1 = arith.constant 0 : i32
    return %c0_i32, %c0_i32_0 : i32, i32
  }
  func.func @transform_5(%arg0: i32) -> (i32, i32) {
    %c0_i32 = arith.constant 0 : i32
    %c0_i32_0 = arith.constant 0 : i32
    %c0_i32_1 = arith.constant 0 : i32
    return %c0_i32, %c0_i32_0 : i32, i32
  }
  func.func @transform_6(%arg0: i32) -> (i32, i32) {
    %c0_i32 = arith.constant 0 : i32
    %c0_i32_0 = arith.constant 0 : i32
    %c0_i32_1 = arith.constant 0 : i32
    return %c0_i32, %c0_i32_0 : i32, i32
  }
  func.func @transform_7(%arg0: i32) -> (i32, i32) {
    %c0_i32 = arith.constant 0 : i32
    %c0_i32_0 = arith.constant 0 : i32
    return %arg0, %c0_i32 : i32, i32
  }
}

</mosaic_0001>

<bundles_post_ra>
// kernel: tpu_custom_call.1
= control target key start
LH: loop header
LB: loop body
LE: loop exit
PB: predicated region body
PF: predicated region fallthrough
CT: control target
= control target key end

     0   :  { %s1907_s24 = smov 0   ;;  %s2526_s0 = inlined_call_operand.vmem [shape: bf16[1024,64], index: 0, kind: input, shape index: {}]   ;;  %s2527_s1 = inlined_call_operand.vmem [shape: bf16[64,128], index: 1, kind: input, shape index: {}]   ;;  %s2528_s2 = inlined_call_operand.vmem [shape: f32[1,128], index: 2, kind: input, shape index: {}]   ;;  %s2529_s3 = inlined_call_operand.vmem [shape: bf16[128,64], index: 3, kind: input, shape index: {}]   ;;  %s2530_s4 = inlined_call_operand.vmem [shape: f32[1,64], index: 4, kind: input, shape index: {}]   ;;  %s2531_s5 = inlined_call_operand.vmem [shape: bf16[64,16], index: 5, kind: input, shape index: {}]   ;;  %s2532_s6 = inlined_call_operand.vmem [shape: f32[1,16], index: 6, kind: input, shape index: {}]   ;;  %s2533_s7 = inlined_call_operand.vmem [shape: bf16[1024,16], index: 7, kind: output, shape index: {}]  }
   0x1 LB: > { %s1501_s25 = sadd.s32 4294967295, %s1865_s24   ;;  %p1505_p0 = scmp.ge.s32.totalorder %s1865_s24, 1  ;;  %s1865_s24 = sphi %s1907_s24, %s17_s24  }
   0x2   : > { %p238_p1 = scmp.lt.s32.totalorder %s1865_s24, 5 }
   0x4   : > { %p239_p2 = pnand %p1505_p0, %p238_p1 }
   0x5   : > { %s1506_s28 = sshll.u32 (!%p239_p2), %s1501_s25, 5 }
   0x6   : > { %242 = sbr.rel (%p239_p2) target bundleno = 954 (0x3ba), region = 48  ;;  %p271_p3 = scmp.lt.s32.totalorder (!%p239_p2), %s1506_s28, 127 }
   0xb   : > { %v1691_v0 = vld [vmem:[%s2527_s1 + $0x18] sm:$0xff]  ;;  %v1690_v1 = vld [vmem:[%s2527_s1 + $0x10] sm:$0xff]  ;;  %s2535_s28 = smov (!%p271_p3, %s1506_s28), 127  ;;  %v1689_v2 = vld [vmem:[%s2527_s1 + $0x8] sm:$0xff]  ;;  %vm431_vm0 = vcmask 523264   ;;  %vm995_vm1 = vcmask 130048  }
   0xc   : > { %484 = vmatpush.bf16.msra.mxu0 %v1691_v0  ;;  %1704 = vmatpush.bf16.msra.mxu3 %v1691_v0  ;;  %s1507_s10 = sshll.u32 %s2535_s28, 2  ;;  %v1688_v3 = vld [vmem:[%s2527_s1] sm:$0xff]  ;;  %v1699_v9 = vld [vmem:[%s2529_s3 + $0x38] sm:$0xff]  ;;  %v1698_v11 = vld [vmem:[%s2529_s3 + $0x30] sm:$0xff]  ;;  %vm1412_vm2 = vcmask 125952  }
   0xd   : > { %s1935_s15 = scalar_lea.vmem %s2526_s0, %s1507_s10  ;;  %685 = vmatpush.bf16.msra.mxu1 %v1699_v9  ;;  %v1697_v12 = vld [vmem:[%s2529_s3 + $0x28] sm:$0xff]  ;;  %v1696_v13 = vld [vmem:[%s2529_s3 + $0x20] sm:$0xff]  ;;  %v1695_v14 = vld [vmem:[%s2529_s3 + $0x18] sm:$0xff]  ;;  %s2346_s30 = scalar_lea.vmem %s2533_s7, %s1507_s10 }
   0xe   : > { %v1672_v4 = vld [vmem:[%s1935_s15] sm:$0xff]  ;;  %v1673_v5 = vld [vmem:[%s1935_s15 + $0x8] sm:$0xff]  ;;  %v1674_v6 = vld [vmem:[%s1935_s15 + $0x10] sm:$0xff] }
   0xf   : > { %v1675_v7 = vld [vmem:[%s1935_s15 + $0x18] sm:$0xff]  ;;  %v1676_v8 = vld [vmem:[%s1935_s15 + $0x20] sm:$0xff]  ;;  %v1677_v10 = vld [vmem:[%s1935_s15 + $0x28] sm:$0xff] }
  0x10   : > { %485 = vmatpush.bf16.msra.mxu0 %v1690_v1  ;;  %1705 = vmatpush.bf16.msra.mxu3 %v1690_v1  ;;  %v1678_v15 = vld [vmem:[%s1935_s15 + $0x30] sm:$0xff]  ;;  %v1693_v17 = vld [vmem:[%s2529_s3 + $0x8] sm:$0xff]  ;;  %v1692_v18 = vld [vmem:[%s2529_s3] sm:$0xff] }
  0x11   : > { %686 = vmatpush.bf16.msra.mxu1 %v1698_v11  ;;  %v1694_v16 = vld [vmem:[%s2529_s3 + $0x10] sm:$0xff]  ;;  %v1679_v19 = vld [vmem:[%s1935_s15 + $0x38] sm:$0xff]  ;;  %v1680_v20 = vld [vmem:[%s1935_s15 + $0x40] sm:$0xff] }
  0x12   : > { %v1981_v22 = vld [vmem:[%s2528_s2] ss:$0 sm:$0xff]  ;;  %v1681_v29 = vld [vmem:[%s1935_s15 + $0x48] sm:$0xff]  ;;  %v1682_v37 = vld [vmem:[%s1935_s15 + $0x50] sm:$0xff] }
  0x13   : > { %v1685_v39 = vld [vmem:[%s1935_s15 + $0x68] sm:$0xff]  ;;  %v1683_v46 = vld [vmem:[%s1935_s15 + $0x58] sm:$0xff]  ;;  %v1686_v48 = vld [vmem:[%s1935_s15 + $0x70] sm:$0xff] }
  0x14   : > { %486 = vmatpush.bf16.msra.mxu0 %v1689_v2  ;;  %1706 = vmatpush.bf16.msra.mxu3 %v1689_v2  ;;  %v1684_v55 = vld [vmem:[%s1935_s15 + $0x60] sm:$0xff]  ;;  %v1687_v57 = vld [vmem:[%s1935_s15 + $0x78] sm:$0xff] }
  0x15   : > { %687 = vmatpush.bf16.msra.mxu1 %v1697_v12 }
  0x18   : > { %487 = vmatpush.bf16.msra.mxu0 %v1688_v3  ;;  %1707 = vmatpush.bf16.msra.mxu3 %v1688_v3 }
  0x19   : > { %688 = vmatpush.bf16.msra.mxu1 %v1696_v13 }
  0x1b   : > { %1590 = vmatmul.msk.bf16.vlgmr.msra.gmra.mxu0 %vm431_vm0, %v1672_v4  ;;  %1603 = vmatmul.msk.bf16.vlgmr.msra.gmra.mxu3 %vm431_vm0, %v1685_v39 }
  0x1c   : > { %1708 = vmatpush.bf16.msrb.mxu3 %v1699_v9 }
  0x1d   : > { %689 = vmatpush.bf16.msra.mxu1 %v1695_v14 }
  0x20   : > { %1709 = vmatpush.bf16.msrb.mxu3 %v1698_v11  ;;  %v1703_v11 = vld [vmem:[%s2531_s5 + $0x18] sm:$0xff] }
  0x21   : > { %690 = vmatpush.bf16.msra.mxu1 %v1694_v16  ;;  %910 = vmatpush.bf16.msra.mxu2 %v1703_v11 }
  0x24   : > { %1710 = vmatpush.bf16.msrb.mxu3 %v1697_v12 }
  0x25   : > { %691 = vmatpush.bf16.msra.mxu1 %v1693_v17 }
  0x28   : > { %1711 = vmatpush.bf16.msrb.mxu3 %v1696_v13 }
  0x29   : > { %692 = vmatpush.bf16.msra.mxu1 %v1692_v18 }
  0x2b   : > { %1591 = vmatmul.msk.bf16.gmra.mxu0 %vm431_vm0, %v1673_v5  ;;  %1604 = vmatmul.msk.bf16.gmra.mxu3 %vm431_vm0, %v1686_v48 }
  0x2c   : > { %1712 = vmatpush.bf16.msrb.mxu3 %v1695_v14 }
  0x30   : > { %1713 = vmatpush.bf16.msrb.mxu3 %v1694_v16 }
  0x34   : > { %1714 = vmatpush.bf16.msrb.mxu3 %v1693_v17  ;;  %v1701_v17 = vld [vmem:[%s2531_s5 + $0x8] sm:$0xff] }
  0x38   : > { %1715 = vmatpush.bf16.msrb.mxu3 %v1692_v18  ;;  %v1700_v18 = vld [vmem:[%s2531_s5] sm:$0xff] }
  0x3b   : > { %1592 = vmatmul.msk.bf16.gmra.mxu0 %vm431_vm0, %v1674_v6  ;;  %1605 = vmatmul.msk.bf16.gmra.mxu3 %vm431_vm0, %v1687_v57 }
  0x3c   : > { %1716 = vmatpush.bf16.msra.mxu3 %v1703_v11 }
  0x4b   : > { %1593 = vmatmul.msk.bf16.gmra.mxu0 %vm431_vm0, %v1675_v7 }
  0x5b   : > { %1594 = vmatmul.msk.bf16.gmra.mxu0 %vm431_vm0, %v1676_v8 }
  0x6b   : > { %1595 = vmatmul.msk.bf16.gmra.mxu0 %vm431_vm0, %v1677_v10 }
  0x7b   : > { %1596 = vmatmul.msk.bf16.gmra.mxu0 %vm431_vm0, %v1678_v15  ;;  %v1702_v15 = vld [vmem:[%s2531_s5 + $0x10] sm:$0xff] }
  0x7c   : > { %911 = vmatpush.bf16.msra.mxu2 %v1702_v15  ;;  %1717 = vmatpush.bf16.msra.mxu3 %v1702_v15 }
  0x80   : > { %912 = vmatpush.bf16.msra.mxu2 %v1701_v17  ;;  %1718 = vmatpush.bf16.msra.mxu3 %v1701_v17 }
  0x84   : > { %913 = vmatpush.bf16.msra.mxu2 %v1700_v18  ;;  %1719 = vmatpush.bf16.msra.mxu3 %v1700_v18 }
  0x8b   : > { %1597 = vmatmul.msk.bf16.gmra.mxu0 %vm431_vm0, %v1679_v19 }
  0x98   : > { %v489_v21 = vpop.f32.mrf.mxu0 }
  0x99   : > { %v490_v23 = vadd.f32 %v1981_v22, %v489_v21 }
  0x9b   : > { %1598 = vmatmul.msk.bf16.gmra.mxu0 %vm431_vm0, %v1680_v20  ;;  %v569_v26 = vmax.f32 %v490_v23, 0.0 }
  0xa0   : > { %v491_v24 = vpop.f32.mrf.mxu0 }
  0xa1   : > { %v492_v25 = vadd.f32 %v1981_v22, %v491_v24 }
  0xa3   : > { %v570_v27 = vmax.f32 %v492_v25, 0.0 }
  0xa5   : > { %v601_v28 = vpack.c.bf16 %v570_v27, %v569_v26 }
  0xa7   : > { %693 = vmatmul.bf16.vlgmr.msra.gmra.mxu1 %v601_v28 }
  0xa8   : > { %v494_v30 = vpop.f32.mrf.mxu0 }
  0xa9   : > { %v495_v31 = vadd.f32 %v1981_v22, %v494_v30 }
  0xab   : > { %1599 = vmatmul.msk.bf16.gmra.mxu0 %vm431_vm0, %v1681_v29  ;;  %v571_v34 = vmax.f32 %v495_v31, 0.0 }
  0xb0   : > { %v496_v32 = vpop.f32.mrf.mxu0 }
  0xb1   : > { %v497_v33 = vadd.f32 %v1981_v22, %v496_v32 }
  0xb3   : > { %v572_v35 = vmax.f32 %v497_v33, 0.0 }
  0xb5   : > { %v602_v36 = vpack.c.bf16 %v572_v35, %v571_v34  ;;  %v2031_v34 = vld [vmem:[%s2530_s4] ss:$0 sm:$0xff] }
  0xb7   : > { %698 = vmatmul.bf16.gmra.mxu1 %v602_v36 }
  0xb8   : > { %v499_v38 = vpop.f32.mrf.mxu0 }
  0xb9   : > { %v500_v40 = vadd.f32 %v1981_v22, %v499_v38 }
  0xbb   : > { %1600 = vmatmul.msk.bf16.gmra.mxu0 %vm431_vm0, %v1682_v37  ;;  %v573_v43 = vmax.f32 %v500_v40, 0.0 }
  0xc0   : > { %v501_v41 = vpop.f32.mrf.mxu0 }
  0xc1   : > { %v502_v42 = vadd.f32 %v1981_v22, %v501_v41 }
  0xc3   : > { %v574_v44 = vmax.f32 %v502_v42, 0.0 }
  0xc5   : > { %v603_v45 = vpack.c.bf16 %v574_v44, %v573_v43 }
  0xc7   : > { %703 = vmatmul.bf16.gmra.mxu1 %v603_v45 }
  0xc8   : > { %v504_v47 = vpop.f32.mrf.mxu0 }
  0xc9   : > { %v505_v49 = vadd.f32 %v1981_v22, %v504_v47 }
  0xcb   : > { %1601 = vmatmul.msk.bf16.gmra.mxu0 %vm431_vm0, %v1683_v46  ;;  %v575_v52 = vmax.f32 %v505_v49, 0.0 }
  0xd0   : > { %v506_v50 = vpop.f32.mrf.mxu0 }
  0xd1   : > { %v507_v51 = vadd.f32 %v1981_v22, %v506_v50 }
  0xd3   : > { %v576_v53 = vmax.f32 %v507_v51, 0.0 }
  0xd5   : > { %v604_v54 = vpack.c.bf16 %v576_v53, %v575_v52 }
  0xd7   : > { %708 = vmatmul.bf16.gmra.mxu1 %v604_v54 }
  0xd8   : > { %v509_v56 = vpop.f32.mrf.mxu0 }
  0xd9   : > { %v510_v58 = vadd.f32 %v1981_v22, %v509_v56 }
  0xdb   : > { %1602 = vmatmul.msk.bf16.gmra.mxu0 %vm431_vm0, %v1684_v55  ;;  %v577_v61 = vmax.f32 %v510_v58, 0.0 }
  0xe0   : > { %v511_v59 = vpop.f32.mrf.mxu0 }
  0xe1   : > { %v512_v60 = vadd.f32 %v1981_v22, %v511_v59 }
  0xe3   : > { %v578_v62 = vmax.f32 %v512_v60, 0.0 }
  0xe5   : > { %v605_v63 = vpack.c.bf16 %v578_v62, %v577_v61 }
  0xe7   : > { %713 = vmatmul.bf16.gmra.mxu1 %v605_v63 }
  0xe8   : > { %v514_v0 = vpop.f32.mrf.mxu0 }
  0xe9   : > { %v515_v1 = vadd.f32 %v1981_v22, %v514_v0 }
  0xeb   : > { %v579_v4 = vmax.f32 %v515_v1, 0.0 }
  0xf0   : > { %v516_v2 = vpop.f32.mrf.mxu0 }
  0xf1   : > { %v517_v3 = vadd.f32 %v1981_v22, %v516_v2 }
  0xf3   : > { %v580_v5 = vmax.f32 %v517_v3, 0.0 }
  0xf5   : > { %v606_v6 = vpack.c.bf16 %v580_v5, %v579_v4 }
  0xf7   : > { %718 = vmatmul.bf16.gmra.mxu1 %v606_v6 }
  0xf8   : > { %v519_v7 = vpop.f32.mrf.mxu0 }
  0xf9   : > { %v520_v8 = vadd.f32 %v1981_v22, %v519_v7 }
  0xfb   : > { %v581_v12 = vmax.f32 %v520_v8, 0.0 }
 0x100   : > { %v521_v9 = vpop.f32.mrf.mxu0 }
 0x101   : > { %v522_v10 = vadd.f32 %v1981_v22, %v521_v9 }
 0x103   : > { %v582_v13 = vmax.f32 %v522_v10, 0.0 }
 0x105   : > { %v607_v14 = vpack.c.bf16 %v582_v13, %v581_v12 }
 0x107   : > { %723 = vmatmul.bf16.gmra.mxu1 %v607_v14  ;;  %v554_v14 = vpop.f32.mrf.mxu3 }
 0x108   : > { %v524_v16 = vpop.f32.mrf.mxu0 }
 0x109   : > { %v525_v19 = vadd.f32 %v1981_v22, %v524_v16 }
 0x10b   : > { %v583_v23 = vmax.f32 %v525_v19, 0.0 }
 0x110   : > { %v526_v20 = vpop.f32.mrf.mxu0 }
 0x111   : > { %v527_v21 = vadd.f32 %v1981_v22, %v526_v20 }
 0x113   : > { %v584_v24 = vmax.f32 %v527_v21, 0.0 }
 0x115   : > { %v608_v25 = vpack.c.bf16 %v584_v24, %v583_v23 }
 0x117   : > { %728 = vmatmul.bf16.gmra.mxu1 %v608_v25  ;;  %v556_v25 = vpop.f32.mrf.mxu3 }
 0x118   : > { %v529_v26 = vpop.f32.mrf.mxu0 }
 0x119   : > { %v530_v27 = vadd.f32 %v1981_v22, %v529_v26 }
 0x11b   : > { %v585_v30 = vmax.f32 %v530_v27, 0.0 }
 0x120   : > { %v531_v28 = vpop.f32.mrf.mxu0 }
 0x121   : > { %v532_v29 = vadd.f32 %v1981_v22, %v531_v28 }
 0x123   : > { %v586_v31 = vmax.f32 %v532_v29, 0.0 }
 0x124   : > { %v694_v32 = vpop.f32.mrf.mxu1 }
 0x125   : > { %v609_v33 = vpack.c.bf16 %v586_v31, %v585_v30  ;;  %v695_v36 = vadd.f32 %v2031_v34, %v694_v32  ;;  %v559_v32 = vpop.f32.mrf.mxu3 }
 0x127   : > { %733 = vmatmul.bf16.gmra.mxu1 %v609_v33  ;;  %v774_v39 = vmax.f32 %v695_v36, 0.0  ;;  %v555_v33 = vadd.f32 %v1981_v22, %v554_v14 }
 0x128   : > { %v534_v35 = vpop.f32.mrf.mxu0 }
 0x129   : > { %v535_v40 = vadd.f32 %v1981_v22, %v534_v35  ;;  %v557_v35 = vadd.f32 %v1981_v22, %v556_v25 }
 0x12b   : > { %v587_v45 = vmax.f32 %v535_v40, 0.0  ;;  %v596_v40 = vmax.f32 %v557_v35, 0.0 }
 0x12c   : > { %v696_v37 = vpop.f32.mrf.mxu1 }
 0x12d   : > { %v697_v38 = vadd.f32 %v2031_v34, %v696_v37 }
 0x12f   : > { %v775_v41 = vmax.f32 %v697_v38, 0.0 }
 0x130   : > { %v536_v42 = vpop.f32.mrf.mxu0 }
 0x131   : > { %v806_v43 = vpack.c.bf16 %v775_v41, %v774_v39  ;;  %v537_v44 = vadd.f32 %v1981_v22, %v536_v42  ;;  %v595_v39 = vmax.f32 %v555_v33, 0.0 }
 0x133   : > { %v588_v46 = vmax.f32 %v537_v44, 0.0  ;;  %1654 = vmatmul.msk.bf16.vlgmr.msra.gmra.mxu2 %vm431_vm0, %v806_v43  ;;  %v614_v43 = vpack.c.bf16 %v596_v40, %v595_v39  ;;  %v561_v44 = vpop.f32.mrf.mxu3 }
 0x134   : > { %v699_v47 = vpop.f32.mrf.mxu1 }
 0x135   : > { %v610_v48 = vpack.c.bf16 %v588_v46, %v587_v45  ;;  %v700_v50 = vadd.f32 %v2031_v34, %v699_v47  ;;  %v560_v47 = vadd.f32 %v1981_v22, %v559_v32 }
 0x137   : > { %738 = vmatmul.bf16.gmra.mxu1 %v610_v48  ;;  %v776_v53 = vmax.f32 %v700_v50, 0.0  ;;  %v562_v48 = vadd.f32 %v1981_v22, %v561_v44 }
 0x138   : > { %v539_v49 = vpop.f32.mrf.mxu0 }
 0x139   : > { %v540_v54 = vadd.f32 %v1981_v22, %v539_v49 }
 0x13b   : > { %v589_v59 = vmax.f32 %v540_v54, 0.0  ;;  %v598_v54 = vmax.f32 %v562_v48, 0.0 }
 0x13c   : > { %v701_v51 = vpop.f32.mrf.mxu1 }
 0x13d   : > { %v702_v52 = vadd.f32 %v2031_v34, %v701_v51 }
 0x13f   : > { %v777_v55 = vmax.f32 %v702_v52, 0.0  ;;  %v564_v52 = vpop.f32.mrf.mxu3 }
 0x140   : > { %v541_v56 = vpop.f32.mrf.mxu0 }
 0x141   : > { %v807_v57 = vpack.c.bf16 %v777_v55, %v776_v53  ;;  %v542_v58 = vadd.f32 %v1981_v22, %v541_v56  ;;  %v597_v53 = vmax.f32 %v560_v47, 0.0 }
 0x143   : > { %v590_v60 = vmax.f32 %v542_v58, 0.0  ;;  %1655 = vmatmul.msk.bf16.gmra.mxu2 %vm431_vm0, %v807_v57  ;;  %v615_v57 = vpack.c.bf16 %v598_v54, %v597_v53 }
 0x144   : > { %v704_v61 = vpop.f32.mrf.mxu1 }
 0x145   : > { %v611_v62 = vpack.c.bf16 %v590_v60, %v589_v59  ;;  %v705_v0 = vadd.f32 %v2031_v34, %v704_v61  ;;  %v565_v61 = vadd.f32 %v1981_v22, %v564_v52 }
 0x147   : > { %743 = vmatmul.bf16.gmra.mxu1 %v611_v62  ;;  %v778_v3 = vmax.f32 %v705_v0, 0.0  ;;  %v566_v58 = vpop.f32.mrf.mxu3 }
 0x148   : > { %v544_v63 = vpop.f32.mrf.mxu0  ;;  %v567_v62 = vadd.f32 %v1981_v22, %v566_v58 }
 0x149   : > { %v545_v4 = vadd.f32 %v1981_v22, %v544_v63 }
 0x14b   : > { %v591_v9 = vmax.f32 %v545_v4, 0.0 }
 0x14c   : > { %v706_v1 = vpop.f32.mrf.mxu1 }
 0x14d   : > { %v707_v2 = vadd.f32 %v2031_v34, %v706_v1 }
 0x14f   : > { %v779_v5 = vmax.f32 %v707_v2, 0.0  ;;  %v599_v2 = vmax.f32 %v565_v61, 0.0 }
 0x150   : > { %v546_v6 = vpop.f32.mrf.mxu0 }
 0x151   : > { %v808_v7 = vpack.c.bf16 %v779_v5, %v778_v3  ;;  %v547_v8 = vadd.f32 %v1981_v22, %v546_v6  ;;  %v600_v3 = vmax.f32 %v567_v62, 0.0 }
 0x153   : > { %v592_v10 = vmax.f32 %v547_v8, 0.0  ;;  %1656 = vmatmul.msk.bf16.gmra.mxu2 %vm431_vm0, %v808_v7  ;;  %v616_v6 = vpack.c.bf16 %v600_v3, %v599_v2 }
 0x154   : > { %v709_v11 = vpop.f32.mrf.mxu1 }
 0x155   : > { %v612_v12 = vpack.c.bf16 %v592_v10, %v591_v9  ;;  %v710_v15 = vadd.f32 %v2031_v34, %v709_v11 }
 0x157   : > { %748 = vmatmul.bf16.gmra.mxu1 %v612_v12  ;;  %v780_v18 = vmax.f32 %v710_v15, 0.0 }
 0x158   : > { %v549_v13 = vpop.f32.mrf.mxu0 }
 0x159   : > { %v550_v19 = vadd.f32 %v1981_v22, %v549_v13 }
 0x15b   : > { %v593_v26 = vmax.f32 %v550_v19, 0.0  ;;  %v2077_v19 = vld [vmem:[%s2532_s6] ss:$0 sm:$0xff] }
 0x15c   : > { %v711_v16 = vpop.f32.mrf.mxu1 }
 0x15d   : > { %v712_v17 = vadd.f32 %v2031_v34, %v711_v16 }
 0x15f   : > { %v781_v20 = vmax.f32 %v712_v17, 0.0 }
 0x160   : > { %v551_v21 = vpop.f32.mrf.mxu0 }
 0x161   : > { %v809_v23 = vpack.c.bf16 %v781_v20, %v780_v18  ;;  %v552_v24 = vadd.f32 %v1981_v22, %v551_v21 }
 0x163   : > { %v594_v27 = vmax.f32 %v552_v24, 0.0  ;;  %1657 = vmatmul.msk.bf16.gmra.mxu2 %vm431_vm0, %v809_v23 }
 0x164   : > { %v714_v28 = vpop.f32.mrf.mxu1 }
 0x165   : > { %v613_v29 = vpack.c.bf16 %v594_v27, %v593_v26  ;;  %v715_v30 = vadd.f32 %v2031_v34, %v714_v28 }
 0x167   : > { %753 = vmatmul.bf16.vlgmr.msrb.gmra.mxu3 %v613_v29  ;;  %v782_v37 = vmax.f32 %v715_v30, 0.0 }
 0x16c   : > { %v716_v31 = vpop.f32.mrf.mxu1 }
 0x16d   : > { %v717_v36 = vadd.f32 %v2031_v34, %v716_v31 }
 0x16f   : > { %v783_v38 = vmax.f32 %v717_v36, 0.0 }
 0x171   : > { %v810_v41 = vpack.c.bf16 %v783_v38, %v782_v37 }
 0x173   : > { %1658 = vmatmul.msk.bf16.gmra.mxu2 %vm431_vm0, %v810_v41 }
 0x174   : > { %v719_v42 = vpop.f32.mrf.mxu1 }
 0x175   : > { %v720_v45 = vadd.f32 %v2031_v34, %v719_v42 }
 0x177   : > { %758 = vmatmul.bf16.gmra.mxu3 %v614_v43  ;;  %v784_v50 = vmax.f32 %v720_v45, 0.0 }
 0x17c   : > { %v721_v46 = vpop.f32.mrf.mxu1 }
 0x17d   : > { %v722_v49 = vadd.f32 %v2031_v34, %v721_v46 }
 0x17f   : > { %v785_v51 = vmax.f32 %v722_v49, 0.0 }
 0x181   : > { %v811_v55 = vpack.c.bf16 %v785_v51, %v784_v50 }
 0x183   : > { %1659 = vmatmul.msk.bf16.gmra.mxu2 %vm431_vm0, %v811_v55 }
 0x184   : > { %v724_v56 = vpop.f32.mrf.mxu1 }
 0x185   : > { %v725_v59 = vadd.f32 %v2031_v34, %v724_v56 }
 0x187   : > { %763 = vmatmul.bf16.gmra.mxu3 %v615_v57  ;;  %v786_v0 = vmax.f32 %v725_v59, 0.0 }
 0x18c   : > { %v726_v60 = vpop.f32.mrf.mxu1 }
 0x18d   : > { %v727_v63 = vadd.f32 %v2031_v34, %v726_v60 }
 0x18f   : > { %v787_v1 = vmax.f32 %v727_v63, 0.0 }
 0x191   : > { %v812_v4 = vpack.c.bf16 %v787_v1, %v786_v0 }
 0x193   : > { %1660 = vmatmul.msk.bf16.gmra.mxu2 %vm431_vm0, %v812_v4 }
 0x194   : > { %v729_v5 = vpop.f32.mrf.mxu1 }
 0x195   : > { %v730_v7 = vadd.f32 %v2031_v34, %v729_v5 }
 0x197   : > { %768 = vmatmul.bf16.gmra.mxu3 %v616_v6  ;;  %v788_v10 = vmax.f32 %v730_v7, 0.0 }
 0x19c   : > { %v731_v8 = vpop.f32.mrf.mxu1 }
 0x19d   : > { %v732_v9 = vadd.f32 %v2031_v34, %v731_v8 }
 0x19f   : > { %v789_v11 = vmax.f32 %v732_v9, 0.0 }
 0x1a1   : > { %v813_v22 = vpack.c.bf16 %v789_v11, %v788_v10 }
 0x1a3   : > { %1661 = vmatmul.msk.bf16.gmra.mxu2 %vm431_vm0, %v813_v22 }
 0x1a4   : > { %v734_v12 = vpop.f32.mrf.mxu1 }
 0x1a5   : > { %v735_v13 = vadd.f32 %v2031_v34, %v734_v12 }
 0x1a7   : > { %v790_v16 = vmax.f32 %v735_v13, 0.0 }
 0x1ac   : > { %v736_v14 = vpop.f32.mrf.mxu1 }
 0x1ad   : > { %v737_v15 = vadd.f32 %v2031_v34, %v736_v14 }
 0x1af   : > { %v791_v17 = vmax.f32 %v737_v15, 0.0 }
 0x1b1   : > { %v814_v18 = vpack.c.bf16 %v791_v17, %v790_v16 }
 0x1b3   : > { %1662 = vmatmul.msk.bf16.gmra.mxu2 %vm431_vm0, %v814_v18 }
 0x1b4   : > { %v739_v20 = vpop.f32.mrf.mxu1 }
 0x1b5   : > { %v740_v25 = vadd.f32 %v2031_v34, %v739_v20 }
 0x1b6   : > { %v915_v21 = vpop.f32.mrf.mxu2 }
 0x1b7   : > { %v2080_v23 = vadd.f32 %v2077_v19, %v915_v21  ;;  %v792_v29 = vmax.f32 %v740_v25, 0.0 }
 0x1b9   : > { %v996_v24 = vsel %vm995_vm1, %v2080_v23, -inf }
 0x1ba   : > { %997 = vmax.xlane.f32.xlu0 %v996_v24 }
 0x1bc   : > { %v741_v26 = vpop.f32.mrf.mxu1 }
 0x1bd   : > { %v742_v27 = vadd.f32 %v2031_v34, %v741_v26 }
 0x1be   : > { %v917_v28 = vpop.f32.mrf.mxu2 }
 0x1bf   : > { %v793_v30 = vmax.f32 %v742_v27, 0.0  ;;  %v2087_v31 = vadd.f32 %v2077_v19, %v917_v28 }
 0x1c1   : > { %v815_v32 = vpack.c.bf16 %v793_v30, %v792_v29  ;;  %v999_v33 = vsel %vm995_vm1, %v2087_v31, -inf }
 0x1c2   : > { %1000 = vmax.xlane.f32.xlu0 %v999_v33 }
 0x1c3   : > { %1663 = vmatmul.msk.bf16.gmra.mxu2 %vm431_vm0, %v815_v32 }
 0x1c4   : > { %v744_v35 = vpop.f32.mrf.mxu1 }
 0x1c5   : > { %v745_v39 = vadd.f32 %v2031_v34, %v744_v35 }
 0x1c6   : > { %v920_v36 = vpop.f32.mrf.mxu2 }
 0x1c7   : > { %v2093_v37 = vadd.f32 %v2077_v19, %v920_v36  ;;  %v794_v43 = vmax.f32 %v745_v39, 0.0 }
 0x1c9   : > { %v1002_v38 = vsel %vm995_vm1, %v2093_v37, -inf }
 0x1ca   : > { %1003 = vmax.xlane.f32.xlu1 %v1002_v38 }
 0x1cc   : > { %v746_v40 = vpop.f32.mrf.mxu1 }
 0x1cd   : > { %v747_v41 = vadd.f32 %v2031_v34, %v746_v40 }
 0x1ce   : > { %v922_v42 = vpop.f32.mrf.mxu2 }
 0x1cf   : > { %v795_v44 = vmax.f32 %v747_v41, 0.0  ;;  %v2100_v45 = vadd.f32 %v2077_v19, %v922_v42 }
 0x1d1   : > { %v816_v46 = vpack.c.bf16 %v795_v44, %v794_v43  ;;  %v1005_v47 = vsel %vm995_vm1, %v2100_v45, -inf }
 0x1d2   : > { %1006 = vmax.xlane.f32.xlu1 %v1005_v47 }
 0x1d3   : > { %1664 = vmatmul.msk.bf16.gmra.mxu2 %vm431_vm0, %v816_v46 }
 0x1d4   : > { %v749_v48 = vpop.f32.mrf.mxu1 }
 0x1d5   : > { %v750_v52 = vadd.f32 %v2031_v34, %v749_v48 }
 0x1d6   : > { %v925_v49 = vpop.f32.mrf.mxu2 }
 0x1d7   : > { %v2106_v50 = vadd.f32 %v2077_v19, %v925_v49  ;;  %v796_v56 = vmax.f32 %v750_v52, 0.0 }
 0x1d9   : > { %v1008_v51 = vsel %vm995_vm1, %v2106_v50, -inf }
 0x1da   : > { %1009 = vmax.xlane.f32.xlu2 %v1008_v51 }
 0x1dc   : > { %v751_v53 = vpop.f32.mrf.mxu1 }
 0x1dd   : > { %v752_v54 = vadd.f32 %v2031_v34, %v751_v53 }
 0x1de   : > { %v927_v55 = vpop.f32.mrf.mxu2 }
 0x1df   : > { %v797_v57 = vmax.f32 %v752_v54, 0.0  ;;  %v2113_v58 = vadd.f32 %v2077_v19, %v927_v55 }
 0x1e1   : > { %v817_v59 = vpack.c.bf16 %v797_v57, %v796_v56  ;;  %v1011_v60 = vsel %vm995_vm1, %v2113_v58, -inf }
 0x1e2   : > { %1012 = vmax.xlane.f32.xlu2 %v1011_v60 }
 0x1e3   : > { %1665 = vmatmul.msk.bf16.gmra.mxu2 %vm431_vm0, %v817_v59 }
 0x1e6   : > { %v930_v61 = vpop.f32.mrf.mxu2 }
 0x1e7   : > { %v2119_v62 = vadd.f32 %v2077_v19, %v930_v61 }
 0x1e9   : > { %v1014_v63 = vsel %vm995_vm1, %v2119_v62, -inf }
 0x1ea   : > { %v754_v0 = vpop.f32.mrf.mxu3  ;;  %1015 = vmax.xlane.f32.xlu0 %v1014_v63 }
 0x1eb   : > { %v755_v3 = vadd.f32 %v2031_v34, %v754_v0 }
 0x1ed   : > { %v798_v7 = vmax.f32 %v755_v3, 0.0 }
 0x1ee   : > { %v932_v1 = vpop.f32.mrf.mxu2 }
 0x1ef   : > { %v2124_v2 = vadd.f32 %v2077_v19, %v932_v1 }
 0x1f1   : > { %v1017_v4 = vsel %vm995_vm1, %v2124_v2, -inf }
 0x1f2   : > { %v756_v5 = vpop.f32.mrf.mxu3  ;;  %1018 = vmax.xlane.f32.xlu1 %v1017_v4 }
 0x1f3   : > { %v757_v6 = vadd.f32 %v2031_v34, %v756_v5 }
 0x1f5   : > { %v799_v8 = vmax.f32 %v757_v6, 0.0 }
 0x1f6   : > { %v935_v9 = vpop.f32.mrf.mxu2 }
 0x1f7   : > { %v818_v10 = vpack.c.bf16 %v799_v8, %v798_v7  ;;  %v2131_v11 = vadd.f32 %v2077_v19, %v935_v9 }
 0x1f9   : > { %1666 = vmatmul.msk.bf16.gmra.mxu2 %vm431_vm0, %v818_v10  ;;  %v1020_v22 = vsel %vm995_vm1, %v2131_v11, -inf }
 0x1fa   : > { %v759_v12 = vpop.f32.mrf.mxu3  ;;  %1021 = vmax.xlane.f32.xlu2 %v1020_v22 }
 0x1fb   : > { %v760_v15 = vadd.f32 %v2031_v34, %v759_v12 }
 0x1fd   : > { %v800_v20 = vmax.f32 %v760_v15, 0.0 }
 0x1fe   : > { %v937_v13 = vpop.f32.mrf.mxu2 }
 0x1ff   : > { %v2137_v14 = vadd.f32 %v2077_v19, %v937_v13 }
 0x201   : > { %v1023_v16 = vsel %vm995_vm1, %v2137_v14, -inf }
 0x202   : > { %v761_v17 = vpop.f32.mrf.mxu3  ;;  %1024 = vmax.xlane.f32.xlu0 %v1023_v16 }
 0x203   : > { %v762_v18 = vadd.f32 %v2031_v34, %v761_v17 }
 0x205   : > { %v801_v21 = vmax.f32 %v762_v18, 0.0 }
 0x206   : > { %v940_v24 = vpop.f32.mrf.mxu2 }
 0x207   : > { %v819_v25 = vpack.c.bf16 %v801_v21, %v800_v20  ;;  %v2144_v26 = vadd.f32 %v2077_v19, %v940_v24 }
 0x209   : > { %1667 = vmatmul.msk.bf16.vlgmr.msra.gmra.mxu3 %vm431_vm0, %v819_v25  ;;  %v1026_v27 = vsel %vm995_vm1, %v2144_v26, -inf }
 0x20a   : > { %v764_v28 = vpop.f32.mrf.mxu3  ;;  %1027 = vmax.xlane.f32.xlu1 %v1026_v27 }
 0x20b   : > { %v765_v32 = vadd.f32 %v2031_v34, %v764_v28 }
 0x20d   : > { %v802_v38 = vmax.f32 %v765_v32, 0.0 }
 0x20e   : > { %v942_v29 = vpop.f32.mrf.mxu2 }
 0x20f   : > { %v2150_v30 = vadd.f32 %v2077_v19, %v942_v29 }
 0x211   : > { %v1029_v33 = vsel %vm995_vm1, %v2150_v30, -inf }
 0x212   : > { %v766_v35 = vpop.f32.mrf.mxu3  ;;  %1030 = vmax.xlane.f32.xlu2 %v1029_v33 }
 0x213   : > { %v767_v36 = vadd.f32 %v2031_v34, %v766_v35 }
 0x215   : > { %v803_v39 = vmax.f32 %v767_v36, 0.0 }
 0x216   : > { %v945_v40 = vpop.f32.mrf.mxu2 }
 0x217   : > { %v820_v41 = vpack.c.bf16 %v803_v39, %v802_v38  ;;  %v2157_v42 = vadd.f32 %v2077_v19, %v945_v40 }
 0x219   : > { %1668 = vmatmul.msk.bf16.gmra.mxu3 %vm431_vm0, %v820_v41  ;;  %v1032_v43 = vsel %vm995_vm1, %v2157_v42, -inf }
 0x21a   : > { %v769_v44 = vpop.f32.mrf.mxu3  ;;  %1033 = vmax.xlane.f32.xlu0 %v1032_v43 }
 0x21b   : > { %v770_v48 = vadd.f32 %v2031_v34, %v769_v44 }
 0x21d   : > { %v804_v53 = vmax.f32 %v770_v48, 0.0 }
 0x21e   : > { %v947_v46 = vpop.f32.mrf.mxu2 }
 0x21f   : > { %v2163_v47 = vadd.f32 %v2077_v19, %v947_v46 }
 0x221   : > { %v1035_v49 = vsel %vm995_vm1, %v2163_v47, -inf }
 0x222   : > { %v771_v51 = vpop.f32.mrf.mxu3  ;;  %1036 = vmax.xlane.f32.xlu1 %v1035_v49 }
 0x223   : > { %v772_v52 = vadd.f32 %v2031_v34, %v771_v51 }
 0x225   : > { %v805_v54 = vmax.f32 %v772_v52, 0.0 }
 0x226   : > { %v950_v55 = vpop.f32.mrf.mxu2 }
 0x227   : > { %v821_v56 = vpack.c.bf16 %v805_v54, %v804_v53  ;;  %v2170_v57 = vadd.f32 %v2077_v19, %v950_v55 }
 0x229   : > { %1669 = vmatmul.msk.bf16.gmra.mxu3 %vm431_vm0, %v821_v56  ;;  %v1038_v59 = vsel %vm995_vm1, %v2170_v57, -inf }
 0x22a   : > { %1039 = vmax.xlane.f32.xlu2 %v1038_v59 }
 0x22d   : > { %v998_v60 = vpop.xlane.xlu0 %997 }
 0x22e   : > { %v2176_v61 = vsub.f32 %v2080_v23, %v998_v60  ;;  %v952_v63 = vpop.f32.mrf.mxu2 }
 0x22f   : > { %v2179_v34 = vadd.f32 %v2077_v19, %v952_v63 }
 0x230   : > { %v1124_v0 = vmul.f32 1.442695, %v2176_v61 }
 0x231   : > { %v1041_v1 = vsel %vm995_vm1, %v2179_v34, -inf }
 0x232   : > { %1731 = vpow2.f32 %v1124_v0  ;;  %1042 = vmax.xlane.f32.xlu0 %v1041_v1 }
 0x235   : > { %v1001_v3 = vpop.xlane.xlu0 %1000 }
 0x236   : > { %v2185_v4 = vsub.f32 %v2087_v31, %v1001_v3  ;;  %v955_v5 = vpop.f32.mrf.mxu2 }
 0x237   : > { %v2188_v6 = vadd.f32 %v2077_v19, %v955_v5 }
 0x238   : > { %v1732_v23 = vpop.eup %1731  ;;  %v1126_v7 = vmul.f32 1.442695, %v2185_v4 }
 0x239   : > { %v1044_v8 = vsel %vm995_vm1, %v2188_v6, -inf  ;;  %v1188_v9 = vsel %vm995_vm1, %v1732_v23, 0.0 }
 0x23a   : > { %1733 = vpow2.f32 %v1126_v7  ;;  %1045 = vmax.xlane.f32.xlu1 %v1044_v8  ;;  %1189 = vadd.xlane.f32.xlu2 %v1188_v9 }
 0x23d   : > { %v1004_v10 = vpop.xlane.xlu1 %1003 }
 0x23e   : > { %v2195_v22 = vsub.f32 %v2093_v37, %v1004_v10  ;;  %v957_v31 = vpop.f32.mrf.mxu2 }
 0x23f   : > { %v2198_v12 = vadd.f32 %v2077_v19, %v957_v31 }
 0x240   : > { %v1734_v13 = vpop.eup %1733  ;;  %v1128_v15 = vmul.f32 1.442695, %v2195_v22 }
 0x241   : > { %v1047_v16 = vsel %vm995_vm1, %v2198_v12, -inf  ;;  %v1191_v17 = vsel %vm995_vm1, %v1734_v13, 0.0 }
 0x242   : > { %1735 = vpow2.f32 %v1128_v15  ;;  %1048 = vmax.xlane.f32.xlu2 %v1047_v16  ;;  %1192 = vadd.xlane.f32.xlu0 %v1191_v17 }
 0x245   : > { %v1007_v18 = vpop.xlane.xlu1 %1006 }
 0x246   : > { %v2205_v20 = vsub.f32 %v2100_v45, %v1007_v18  ;;  %v960_v37 = vpop.f32.mrf.mxu2 }
 0x247   : > { %v2208_v21 = vadd.f32 %v2077_v19, %v960_v37 }
 0x248   : > { %v1736_v24 = vpop.eup %1735  ;;  %v1130_v25 = vmul.f32 1.442695, %v2205_v20 }
 0x249   : > { %v1194_v27 = vsel %vm995_vm1, %v1736_v24, 0.0  ;;  %v1050_v28 = vsel %vm995_vm1, %v2208_v21, -inf }
 0x24a   : > { %1737 = vpow2.f32 %v1130_v25  ;;  %1195 = vadd.xlane.f32.xlu1 %v1194_v27  ;;  %1051 = vmax.xlane.f32.xlu0 %v1050_v28 }
 0x24d   : > { %v1010_v29 = vpop.xlane.xlu2 %1009 }
 0x24e   : > { %v2215_v32 = vsub.f32 %v2106_v50, %v1010_v29  ;;  %v962_v45 = vpop.f32.mrf.mxu2 }
 0x24f   : > { %v2218_v33 = vadd.f32 %v2077_v19, %v962_v45 }
 0x250   : > { %v1738_v35 = vpop.eup %1737  ;;  %v1132_v36 = vmul.f32 1.442695, %v2215_v32 }
 0x251   : > { %v1053_v38 = vsel %vm995_vm1, %v2218_v33, -inf  ;;  %v1197_v39 = vsel %vm995_vm1, %v1738_v35, 0.0 }
 0x252   : > { %1739 = vpow2.f32 %v1132_v36  ;;  %1054 = vmax.xlane.f32.xlu1 %v1053_v38  ;;  %1198 = vadd.xlane.f32.xlu2 %v1197_v39 }
 0x255   : > { %v1013_v40 = vpop.xlane.xlu2 %1012 }
 0x256   : > { %v2225_v41 = vsub.f32 %v2113_v58, %v1013_v40  ;;  %v965_v50 = vpop.f32.mrf.mxu2 }
 0x257   : > { %v2228_v43 = vadd.f32 %v2077_v19, %v965_v50 }
 0x258   : > { %v1740_v44 = vpop.eup %1739  ;;  %v1134_v46 = vmul.f32 1.442695, %v2225_v41 }
 0x259   : > { %v1056_v48 = vsel %vm995_vm1, %v2228_v43, -inf  ;;  %v1200_v49 = vsel %vm995_vm1, %v1740_v44, 0.0 }
 0x25a   : > { %1741 = vpow2.f32 %v1134_v46  ;;  %1057 = vmax.xlane.f32.xlu2 %v1056_v48  ;;  %1201 = vadd.xlane.f32.xlu0 %v1200_v49 }
 0x25d   : > { %v1016_v51 = vpop.xlane.xlu0 %1015 }
 0x25e   : > { %v2235_v52 = vsub.f32 %v2119_v62, %v1016_v51  ;;  %v967_v58 = vpop.f32.mrf.mxu2 }
 0x25f   : > { %v2238_v53 = vadd.f32 %v2077_v19, %v967_v58 }
 0x260   : > { %v1742_v54 = vpop.eup %1741  ;;  %v1136_v55 = vmul.f32 1.442695, %v2235_v52 }
 0x261   : > { %v1203_v56 = vsel %vm995_vm1, %v1742_v54, 0.0  ;;  %v1059_v59 = vsel %vm995_vm1, %v2238_v53, -inf }
 0x262   : > { %1743 = vpow2.f32 %v1136_v55  ;;  %1204 = vadd.xlane.f32.xlu1 %v1203_v56  ;;  %1060 = vmax.xlane.f32.xlu0 %v1059_v59 }
 0x265   : > { %v1019_v60 = vpop.xlane.xlu1 %1018 }
 0x266   : > { %v2245_v63 = vsub.f32 %v2124_v2, %v1019_v60  ;;  %v970_v62 = vpop.f32.mrf.mxu2 }
 0x267   : > { %v2248_v0 = vadd.f32 %v2077_v19, %v970_v62 }
 0x268   : > { %v1744_v1 = vpop.eup %1743  ;;  %v1138_v3 = vmul.f32 1.442695, %v2245_v63 }
 0x269   : > { %v1062_v5 = vsel %vm995_vm1, %v2248_v0, -inf  ;;  %v1206_v23 = vsel %vm995_vm1, %v1744_v1, 0.0 }
 0x26a   : > { %1745 = vpow2.f32 %v1138_v3  ;;  %1063 = vmax.xlane.f32.xlu1 %v1062_v5  ;;  %1207 = vadd.xlane.f32.xlu2 %v1206_v23 }
 0x26d   : > { %v1022_v7 = vpop.xlane.xlu2 %1021 }
 0x26e   : > { %v2255_v8 = vsub.f32 %v2131_v11, %v1022_v7  ;;  %v972_v2 = vpop.f32.mrf.mxu2 }
 0x26f   : > { %v2258_v9 = vadd.f32 %v2077_v19, %v972_v2 }
 0x270   : > { %v1746_v10 = vpop.eup %1745  ;;  %v1140_v31 = vmul.f32 1.442695, %v2255_v8 }
 0x271   : > { %v1209_v13 = vsel %vm995_vm1, %v1746_v10, 0.0  ;;  %v1065_v15 = vsel %vm995_vm1, %v2258_v9, -inf }
 0x272   : > { %1747 = vpow2.f32 %v1140_v31  ;;  %1210 = vadd.xlane.f32.xlu0 %v1209_v13  ;;  %1066 = vmax.xlane.f32.xlu2 %v1065_v15 }
 0x275   : > { %v1025_v16 = vpop.xlane.xlu0 %1024 }
 0x276   : > { %v2265_v17 = vsub.f32 %v2137_v14, %v1025_v16 }
 0x278   : > { %v1748_v11 = vpop.eup %1747  ;;  %v1142_v18 = vmul.f32 1.442695, %v2265_v17 }
 0x279   : > { %v1212_v37 = vsel %vm995_vm1, %v1748_v11, 0.0 }
 0x27a   : > { %1749 = vpow2.f32 %v1142_v18  ;;  %1213 = vadd.xlane.f32.xlu1 %v1212_v37 }
 0x27c   : > { %v975_v24 = vpop.f32.mrf.mxu2 }
 0x27d   : > { %v2270_v25 = vadd.f32 %v2077_v19, %v975_v24  ;;  %v1028_v27 = vpop.xlane.xlu1 %1027 }
 0x27e   : > { %v2273_v28 = vsub.f32 %v2144_v26, %v1028_v27 }
 0x27f   : > { %v1068_v29 = vsel %vm995_vm1, %v2270_v25, -inf }
 0x280   : > { %v1750_v14 = vpop.eup %1749  ;;  %v1144_v45 = vmul.f32 1.442695, %v2273_v28  ;;  %1069 = vmax.xlane.f32.xlu0 %v1068_v29 }
 0x281   : > { %v1215_v35 = vsel %vm995_vm1, %v1750_v14, 0.0 }
 0x282   : > { %1751 = vpow2.f32 %v1144_v45  ;;  %1216 = vadd.xlane.f32.xlu2 %v1215_v35 }
 0x284   : > { %v977_v36 = vpop.f32.mrf.mxu2 }
 0x285   : > { %v2280_v38 = vadd.f32 %v2077_v19, %v977_v36  ;;  %v1031_v55 = vpop.xlane.xlu2 %1030 }
 0x287   : > { %v1071_v39 = vsel %vm995_vm1, %v2280_v38, -inf }
 0x288   : > { %v1752_v26 = vpop.eup %1751  ;;  %1072 = vmax.xlane.f32.xlu1 %v1071_v39 }
 0x289   : > { %v1218_v40 = vsel %vm995_vm1, %v1752_v26, 0.0 }
 0x28a   : > { %1219 = vadd.xlane.f32.xlu0 %v1218_v40 }
 0x28c   : > { %v980_v50 = vpop.f32.mrf.mxu3 }
 0x28d   : > { %v2286_v44 = vadd.f32 %v2077_v19, %v980_v50  ;;  %v1034_v58 = vpop.xlane.xlu0 %1033 }
 0x28e   : > { %v2299_v59 = vsub.f32 %v2157_v42, %v1034_v58 }
 0x28f   : > { %v1074_v46 = vsel %vm995_vm1, %v2286_v44, -inf }
 0x290   : > { %1075 = vmax.xlane.f32.xlu2 %v1074_v46  ;;  %v1148_v62 = vmul.f32 1.442695, %v2299_v59 }
 0x292   : > { %1753 = vpow2.f32 %v1148_v62 }
 0x294   : > { %v982_v48 = vpop.f32.mrf.mxu3 }
 0x295   : > { %v2291_v49 = vadd.f32 %v2077_v19, %v982_v48  ;;  %v1037_v1 = vpop.xlane.xlu1 %1036 }
 0x296   : > { %v2305_v5 = vsub.f32 %v2163_v47, %v1037_v1  ;;  %v2318_v47 = vsub.f32 %v2150_v30, %v1031_v55 }
 0x297   : > { %v1077_v51 = vsel %vm995_vm1, %v2291_v49, -inf }
 0x298   : > { %1078 = vmax.xlane.f32.xlu0 %v1077_v51  ;;  %v1150_v31 = vmul.f32 1.442695, %v2305_v5  ;;  %v1754_v15 = vpop.eup %1753  ;;  %v1146_v30 = vmul.f32 1.442695, %v2318_v47 }
 0x299   : > { %v1224_v27 = vsel %vm995_vm1, %v1754_v15, 0.0 }
 0x29a   : > { %1755 = vpow2.f32 %v1150_v31 }
 0x29c   : > { %v985_v54 = vpop.f32.mrf.mxu3 }
 0x29d   : > { %v2296_v56 = vadd.f32 %v2077_v19, %v985_v54  ;;  %v1040_v23 = vpop.xlane.xlu2 %1039 }
 0x29e   : > { %v2332_v36 = vsub.f32 %v2170_v57, %v1040_v23 }
 0x29f   : > { %v1080_v60 = vsel %vm995_vm1, %v2296_v56, -inf }
 0x2a0   : > { %1081 = vmax.xlane.f32.xlu1 %v1080_v60  ;;  %v1756_v14 = vpop.eup %1755  ;;  %v1152_v57 = vmul.f32 1.442695, %v2332_v36 }
 0x2a1   : > { %v1227_v48 = vsel %vm995_vm1, %v1756_v14, 0.0 }
 0x2a4   : > { %v987_v3 = vpop.f32.mrf.mxu3 }
 0x2a5   : > { %v2308_v7 = vadd.f32 %v2077_v19, %v987_v3  ;;  %v1043_v2 = vpop.xlane.xlu0 %1042 }
 0x2a6   : > { %v2311_v42 = vsub.f32 %v2179_v34, %v1043_v2 }
 0x2a7   : > { %v1083_v10 = vsel %vm995_vm1, %v2308_v7, -inf }
 0x2a8   : > { %1084 = vmax.xlane.f32.xlu2 %v1083_v10  ;;  %v1154_v13 = vmul.f32 1.442695, %v2311_v42 }
 0x2ac   : > { %v990_v16 = vpop.f32.mrf.mxu3 }
 0x2ad   : > { %v2321_v11 = vadd.f32 %v2077_v19, %v990_v16  ;;  %v1046_v18 = vpop.xlane.xlu1 %1045  ;;  %v1190_v34 = vpop.xlane.xlu2 %1189 }
 0x2ae   : > { %v2324_v37 = vsub.f32 %v2188_v6, %v1046_v18  ;;  %1757 = vlog2.f32 %v1190_v34 }
 0x2af   : > { %1759 = vpow2.f32 %v1154_v13  ;;  %v1086_v24 = vsel %vm995_vm1, %v2321_v11, -inf }
 0x2b0   : > { %1087 = vmax.xlane.f32.xlu0 %v1086_v24  ;;  %1225 = vadd.xlane.f32.xlu2 %v1224_v27  ;;  %v1156_v29 = vmul.f32 1.442695, %v2324_v37  ;;  %1761 = vpow2.f32 %v1146_v30 }
 0x2b2   : > { %1763 = vpow2.f32 %v1156_v29 }
 0x2b4   : > { %v1758_v45 = vpop.eup %1757  ;;  %v992_v35 = vpop.f32.mrf.mxu3 }
 0x2b5   : > { %v1760_v6 = vpop.eup %1759  ;;  %v1285_v39 = vmul.f32 0.6931472, %v1758_v45  ;;  %v2335_v26 = vadd.f32 %v2077_v19, %v992_v35  ;;  %v1193_v40 = vpop.xlane.xlu0 %1192 }
 0x2b6   : > { %1765 = vlog2.f32 %v1193_v40  ;;  %v1233_v19 = vsel %vm995_vm1, %v1760_v6, 0.0  ;;  %v1762_v51 = vpop.eup %1761  ;;  %v1049_v58 = vpop.xlane.xlu2 %1048 }
 0x2b7   : > { %v1348_v50 = vsub.f32 %v2176_v61, %v1285_v39  ;;  %v1089_v46 = vsel %vm995_vm1, %v2335_v26, -inf  ;;  %1767 = vpow2.f32 %v1152_v57  ;;  %v2353_v60 = vsub.f32 %v2198_v12, %v1049_v58 }
 0x2b8   : > { %1090 = vmax.xlane.f32.xlu1 %v1089_v46  ;;  %1228 = vadd.xlane.f32.xlu0 %v1227_v48  ;;  %v1764_v54 = vpop.eup %1763  ;;  %v1221_v10 = vsel %vm995_vm1, %v1762_v51, 0.0 }
 0x2b9   : > { %v1380_v61 = vpack.c.bf16 %v1348_v50, %v1348_v50  ;;  %1234 = vadd.xlane.f32.xlu2 %v1233_v19  ;;  %v1236_v31 = vsel %vm995_vm1, %v1764_v54, 0.0  ;;  %v1158_v12 = vmul.f32 1.442695, %v2353_v60 }
 0x2bb   : > { %1413 = vst.msk [vmem:[%s2346_s30] sm:$0xf] %vm1412_vm2, %v1380_v61 }
 0x2bc   : > { %v1766_v55 = vpop.eup %1765 }
 0x2bd   : > { %v1287_v62 = vmul.f32 0.6931472, %v1766_v55  ;;  %v1196_v1 = vpop.xlane.xlu1 %1195  ;;  %v1052_v3 = vpop.xlane.xlu0 %1051 }
 0x2be   : > { %1769 = vlog2.f32 %v1196_v1  ;;  %v2356_v23 = vsub.f32 %v2208_v21, %v1052_v3  ;;  %v1768_v16 = vpop.eup %1767 }
 0x2bf   : > { %v1349_v2 = vsub.f32 %v2185_v4, %v1287_v62  ;;  %v1230_v30 = vsel %vm995_vm1, %v1768_v16, 0.0 }
 0x2c0   : > { %v1160_v13 = vmul.f32 1.442695, %v2356_v23  ;;  %1222 = vadd.xlane.f32.xlu1 %v1221_v10  ;;  %1237 = vadd.xlane.f32.xlu0 %v1236_v31 }
 0x2c1   : > { %v1381_v15 = vpack.c.bf16 %v1349_v2, %v1349_v2 }
 0x2c2   : > { %1771 = vpow2.f32 %v1160_v13 }
 0x2c3   : > { %1414 = vst.msk [vmem:[%s2346_s30 + $0x4] sm:$0xf] %vm1412_vm2, %v1381_v15  ;;  %1773 = vpow2.f32 %v1158_v12 }
 0x2c4   : > { %v1770_v18 = vpop.eup %1769 }
 0x2c5   : > { %v1289_v21 = vmul.f32 0.6931472, %v1770_v18  ;;  %v1055_v4 = vpop.xlane.xlu1 %1054  ;;  %v1199_v34 = vpop.xlane.xlu2 %1198 }
 0x2c6   : > { %v2366_v24 = vsub.f32 %v2218_v33, %v1055_v4  ;;  %1775 = vlog2.f32 %v1199_v34 }
 0x2c7   : > { %v1350_v27 = vsub.f32 %v2195_v22, %v1289_v21 }
 0x2c8   : > { %v1772_v29 = vpop.eup %1771  ;;  %v1162_v14 = vmul.f32 1.442695, %v2366_v24  ;;  %1231 = vadd.xlane.f32.xlu1 %v1230_v30 }
 0x2c9   : > { %v1382_v45 = vpack.c.bf16 %v1350_v27, %v1350_v27  ;;  %v1242_v35 = vsel %vm995_vm1, %v1772_v29, 0.0  ;;  %v1774_v6 = vpop.eup %1773 }
 0x2ca   : > { %1777 = vpow2.f32 %v1162_v14  ;;  %1243 = vadd.xlane.f32.xlu2 %v1242_v35  ;;  %v1239_v48 = vsel %vm995_vm1, %v1774_v6, 0.0 }
 0x2cb   : > { %1415 = vst.msk [vmem:[%s2346_s30 + $0x8] sm:$0xf] %vm1412_vm2, %v1382_v45 }
 0x2cc   : > { %v1776_v33 = vpop.eup %1775 }
 0x2cd   : > { %v1291_v39 = vmul.f32 0.6931472, %v1776_v33  ;;  %v1058_v40 = vpop.xlane.xlu2 %1057  ;;  %v1202_v50 = vpop.xlane.xlu0 %1201 }
 0x2ce   : > { %v2375_v22 = vsub.f32 %v2228_v43, %v1058_v40  ;;  %1779 = vlog2.f32 %v1202_v50 }
 0x2cf   : > { %v1351_v46 = vsub.f32 %v2205_v20, %v1291_v39 }
 0x2d0   : > { %v1778_v19 = vpop.eup %1777  ;;  %v1164_v57 = vmul.f32 1.442695, %v2375_v22  ;;  %1240 = vadd.xlane.f32.xlu1 %v1239_v48 }
 0x2d1   : > { %v1383_v61 = vpack.c.bf16 %v1351_v46, %v1351_v46  ;;  %v1245_v51 = vsel %vm995_vm1, %v1778_v19, 0.0 }
 0x2d2   : > { %1781 = vpow2.f32 %v1164_v57  ;;  %1246 = vadd.xlane.f32.xlu0 %v1245_v51 }
 0x2d3   : > { %1416 = vst.msk [vmem:[%s2346_s30 + $0xc] sm:$0xf] %vm1412_vm2, %v1383_v61 }
 0x2d4   : > { %v1780_v58 = vpop.eup %1779 }
 0x2d5   : > { %v1293_v43 = vmul.f32 0.6931472, %v1780_v58  ;;  %v1205_v54 = vpop.xlane.xlu1 %1204  ;;  %v1061_v55 = vpop.xlane.xlu0 %1060 }
 0x2d6   : > { %1783 = vlog2.f32 %v1205_v54  ;;  %v2384_v20 = vsub.f32 %v2238_v53, %v1061_v55 }
 0x2d7   : > { %v1352_v62 = vsub.f32 %v2215_v32, %v1293_v43 }
 0x2d8   : > { %v1782_v1 = vpop.eup %1781  ;;  %v1166_v3 = vmul.f32 1.442695, %v2384_v20 }
 0x2d9   : > { %v1384_v2 = vpack.c.bf16 %v1352_v62, %v1352_v62  ;;  %v1248_v10 = vsel %vm995_vm1, %v1782_v1, 0.0 }
 0x2da   : > { %1785 = vpow2.f32 %v1166_v3  ;;  %1249 = vadd.xlane.f32.xlu1 %v1248_v10 }
 0x2db   : > { %1417 = vst.msk [vmem:[%s2346_s30 + $0x10] sm:$0xf] %vm1412_vm2, %v1384_v2 }
 0x2dc   : > { %v1784_v31 = vpop.eup %1783 }
 0x2dd   : > { %v1295_v13 = vmul.f32 0.6931472, %v1784_v31  ;;  %v1064_v12 = vpop.xlane.xlu1 %1063  ;;  %v1208_v15 = vpop.xlane.xlu2 %1207 }
 0x2de   : > { %v2392_v53 = vsub.f32 %v2248_v0, %v1064_v12  ;;  %1787 = vlog2.f32 %v1208_v15 }
 0x2df   : > { %v1353_v32 = vsub.f32 %v2225_v41, %v1295_v13 }
 0x2e0   : > { %v1786_v16 = vpop.eup %1785  ;;  %v1168_v18 = vmul.f32 1.442695, %v2392_v53 }
 0x2e1   : > { %v1385_v21 = vpack.c.bf16 %v1353_v32, %v1353_v32  ;;  %v1251_v4 = vsel %vm995_vm1, %v1786_v16, 0.0 }
 0x2e2   : > { %1789 = vpow2.f32 %v1168_v18  ;;  %1252 = vadd.xlane.f32.xlu2 %v1251_v4 }
 0x2e3   : > { %1418 = vst.msk [vmem:[%s2346_s30 + $0x14] sm:$0xf] %vm1412_vm2, %v1385_v21 }
 0x2e4   : > { %v1788_v34 = vpop.eup %1787 }
 0x2e5   : > { %v1297_v27 = vmul.f32 0.6931472, %v1788_v34  ;;  %v1067_v30 = vpop.xlane.xlu2 %1066  ;;  %v1211_v29 = vpop.xlane.xlu0 %1210 }
 0x2e6   : > { %v2400_v0 = vsub.f32 %v2258_v9, %v1067_v30  ;;  %1791 = vlog2.f32 %v1211_v29 }
 0x2e7   : > { %v1354_v41 = vsub.f32 %v2235_v52, %v1297_v27 }
 0x2e8   : > { %v1790_v14 = vpop.eup %1789  ;;  %v1170_v45 = vmul.f32 1.442695, %v2400_v0 }
 0x2e9   : > { %v1386_v35 = vpack.c.bf16 %v1354_v41, %v1354_v41  ;;  %v1254_v6 = vsel %vm995_vm1, %v1790_v14, 0.0 }
 0x2ea   : > { %1793 = vpow2.f32 %v1170_v45  ;;  %1255 = vadd.xlane.f32.xlu0 %v1254_v6 }
 0x2eb   : > { %1419 = vst.msk [vmem:[%s2346_s30 + $0x18] sm:$0xf] %vm1412_vm2, %v1386_v35 }
 0x2ec   : > { %v1792_v33 = vpop.eup %1791 }
 0x2ed   : > { %v1299_v39 = vmul.f32 0.6931472, %v1792_v33  ;;  %v1214_v40 = vpop.xlane.xlu1 %1213 }
 0x2ee   : > { %1795 = vlog2.f32 %v1214_v40 }
 0x2ef   : > { %v1355_v9 = vsub.f32 %v2245_v63, %v1299_v39 }
 0x2f0   : > { %v1794_v50 = vpop.eup %1793 }
 0x2f1   : > { %v1387_v52 = vpack.c.bf16 %v1355_v9, %v1355_v9  ;;  %v1257_v46 = vsel %vm995_vm1, %v1794_v50, 0.0 }
 0x2f2   : > { %1258 = vadd.xlane.f32.xlu1 %v1257_v46 }
 0x2f3   : > { %1420 = vst.msk [vmem:[%s2346_s30 + $0x1c] sm:$0xf] %vm1412_vm2, %v1387_v52  ;;  %v1070_v48 = vpop.xlane.xlu0 %1069 }
 0x2f4   : > { %v1796_v19 = vpop.eup %1795  ;;  %v2412_v57 = vsub.f32 %v2270_v25, %v1070_v48 }
 0x2f5   : > { %v1301_v61 = vmul.f32 0.6931472, %v1796_v19  ;;  %v1217_v51 = vpop.xlane.xlu2 %1216 }
 0x2f6   : > { %v1172_v58 = vmul.f32 1.442695, %v2412_v57  ;;  %1797 = vlog2.f32 %v1217_v51 }
 0x2f7   : > { %v1356_v63 = vsub.f32 %v2255_v8, %v1301_v61 }
 0x2f8   : > { %1799 = vpow2.f32 %v1172_v58 }
 0x2f9   : > { %v1388_v43 = vpack.c.bf16 %v1356_v63, %v1356_v63 }
 0x2fb   : > { %1421 = vst.msk [vmem:[%s2346_s30 + $0x20] sm:$0xf] %vm1412_vm2, %v1388_v43  ;;  %v1073_v54 = vpop.xlane.xlu1 %1072 }
 0x2fc   : > { %v1798_v55 = vpop.eup %1797  ;;  %v2419_v62 = vsub.f32 %v2280_v38, %v1073_v54 }
 0x2fd   : > { %v1303_v1 = vmul.f32 0.6931472, %v1798_v55  ;;  %v1220_v25 = vpop.xlane.xlu0 %1219 }
 0x2fe   : > { %v1800_v3 = vpop.eup %1799  ;;  %v1174_v2 = vmul.f32 1.442695, %v2419_v62  ;;  %1801 = vlog2.f32 %v1220_v25 }
 0x2ff   : > { %v1357_v10 = vsub.f32 %v2265_v17, %v1303_v1  ;;  %v1260_v8 = vsel %vm995_vm1, %v1800_v3, 0.0 }
 0x300   : > { %1803 = vpow2.f32 %v1174_v2  ;;  %1261 = vadd.xlane.f32.xlu2 %v1260_v8 }
 0x301   : > { %v1389_v31 = vpack.c.bf16 %v1357_v10, %v1357_v10 }
 0x303   : > { %1422 = vst.msk [vmem:[%s2346_s30 + $0x24] sm:$0xf] %vm1412_vm2, %v1389_v31  ;;  %v1076_v13 = vpop.xlane.xlu2 %1075 }
 0x304   : > { %v1802_v12 = vpop.eup %1801  ;;  %v2427_v38 = vsub.f32 %v2286_v44, %v1076_v13 }
 0x305   : > { %v1305_v15 = vmul.f32 0.6931472, %v1802_v12 }
 0x306   : > { %v1804_v32 = vpop.eup %1803  ;;  %v1176_v16 = vmul.f32 1.442695, %v2427_v38 }
 0x307   : > { %v1358_v18 = vsub.f32 %v2273_v28, %v1305_v15  ;;  %v1263_v17 = vsel %vm995_vm1, %v1804_v32, 0.0 }
 0x308   : > { %1805 = vpow2.f32 %v1176_v16  ;;  %1264 = vadd.xlane.f32.xlu0 %v1263_v17 }
 0x309   : > { %v1390_v21 = vpack.c.bf16 %v1358_v18, %v1358_v18 }
 0x30b   : > { %1423 = vst.msk [vmem:[%s2346_s30 + $0x28] sm:$0xf] %vm1412_vm2, %v1390_v21  ;;  %v1079_v4 = vpop.xlane.xlu0 %1078 }
 0x30c   : > { %v2435_v34 = vsub.f32 %v2291_v49, %v1079_v4 }
 0x30e   : > { %v1806_v27 = vpop.eup %1805  ;;  %v1178_v44 = vmul.f32 1.442695, %v2435_v34 }
 0x30f   : > { %v1266_v30 = vsel %vm995_vm1, %v1806_v27, 0.0 }
 0x310   : > { %1807 = vpow2.f32 %v1178_v44  ;;  %1267 = vadd.xlane.f32.xlu1 %v1266_v30 }
 0x313   : > { %v1082_v29 = vpop.xlane.xlu1 %1081 }
 0x314   : > { %v2440_v28 = vsub.f32 %v2296_v56, %v1082_v29 }
 0x316   : > { %v1808_v41 = vpop.eup %1807  ;;  %v1180_v14 = vmul.f32 1.442695, %v2440_v28 }
 0x317   : > { %v1269_v45 = vsel %vm995_vm1, %v1808_v41, 0.0 }
 0x318   : > { %1809 = vpow2.f32 %v1180_v14  ;;  %1270 = vadd.xlane.f32.xlu2 %v1269_v45 }
 0x31b   : > { %v1085_v49 = vpop.xlane.xlu2 %1084 }
 0x31c   : > { %v2445_v35 = vsub.f32 %v2308_v7, %v1085_v49 }
 0x31e   : > { %v1810_v6 = vpop.eup %1809  ;;  %v1182_v33 = vmul.f32 1.442695, %v2445_v35 }
 0x31f   : > { %v1272_v39 = vsel %vm995_vm1, %v1810_v6, 0.0 }
 0x320   : > { %1811 = vpow2.f32 %v1182_v33  ;;  %1273 = vadd.xlane.f32.xlu0 %v1272_v39 }
 0x323   : > { %v1226_v56 = vpop.xlane.xlu2 %1225  ;;  %v1088_v40 = vpop.xlane.xlu0 %1087 }
 0x324   : > { %1813 = vlog2.f32 %v1226_v56  ;;  %v2450_v9 = vsub.f32 %v2321_v11, %v1088_v40 }
 0x326   : > { %v1812_v50 = vpop.eup %1811  ;;  %v1184_v52 = vmul.f32 1.442695, %v2450_v9 }
 0x327   : > { %v1275_v46 = vsel %vm995_vm1, %v1812_v50, 0.0 }
 0x328   : > { %1815 = vpow2.f32 %v1184_v52  ;;  %1276 = vadd.xlane.f32.xlu1 %v1275_v46 }
 0x32a   : > { %v1814_v7 = vpop.eup %1813 }
 0x32b   : > { %v1309_v48 = vmul.f32 0.6931472, %v1814_v7  ;;  %v1091_v19 = vpop.xlane.xlu1 %1090  ;;  %v1229_v61 = vpop.xlane.xlu0 %1228 }
 0x32c   : > { %v2455_v51 = vsub.f32 %v2335_v26, %v1091_v19  ;;  %v1235_v58 = vpop.xlane.xlu2 %1234  ;;  %1817 = vlog2.f32 %v1229_v61 }
 0x32d   : > { %v1360_v11 = vsub.f32 %v2299_v59, %v1309_v48  ;;  %1819 = vlog2.f32 %v1235_v58 }
 0x32e   : > { %v1816_v63 = vpop.eup %1815  ;;  %v1186_v43 = vmul.f32 1.442695, %v2455_v51 }
 0x32f   : > { %v1392_v54 = vpack.c.bf16 %v1360_v11, %v1360_v11  ;;  %v1278_v55 = vsel %vm995_vm1, %v1816_v63, 0.0 }
 0x330   : > { %1821 = vpow2.f32 %v1186_v43  ;;  %1279 = vadd.xlane.f32.xlu2 %v1278_v55 }
 0x331   : > { %1425 = vst.msk [vmem:[%s2346_s30 + $0x30] sm:$0xf] %vm1412_vm2, %v1392_v54 }
 0x332   : > { %v1818_v1 = vpop.eup %1817 }
 0x333   : > { %v1820_v25 = vpop.eup %1819  ;;  %v1311_v26 = vmul.f32 0.6931472, %v1818_v1  ;;  %v1223_v3 = vpop.xlane.xlu1 %1222 }
 0x334   : > { %v1238_v2 = vpop.xlane.xlu0 %1237  ;;  %v1315_v10 = vmul.f32 0.6931472, %v1820_v25  ;;  %1823 = vlog2.f32 %v1223_v3 }
 0x335   : > { %v1361_v59 = vsub.f32 %v2305_v5, %v1311_v26  ;;  %1825 = vlog2.f32 %v1238_v2 }
 0x336   : > { %v1822_v8 = vpop.eup %1821  ;;  %v1363_v31 = vsub.f32 %v2311_v42, %v1315_v10 }
 0x337   : > { %v1393_v13 = vpack.c.bf16 %v1361_v59, %v1361_v59  ;;  %v1281_v12 = vsel %vm995_vm1, %v1822_v8, 0.0 }
 0x338   : > { %v1395_v15 = vpack.c.bf16 %v1363_v31, %v1363_v31  ;;  %1282 = vadd.xlane.f32.xlu0 %v1281_v12 }
 0x339   : > { %1426 = vst.msk [vmem:[%s2346_s30 + $0x34] sm:$0xf] %vm1412_vm2, %v1393_v13 }
 0x33a   : > { %v1824_v32 = vpop.eup %1823  ;;  %1428 = vst.msk [vmem:[%s2346_s30 + $0x3c] sm:$0xf] %vm1412_vm2, %v1395_v15 }
 0x33b   : > { %v1826_v16 = vpop.eup %1825  ;;  %v1307_v18 = vmul.f32 0.6931472, %v1824_v32  ;;  %v1232_v17 = vpop.xlane.xlu1 %1231 }
 0x33c   : > { %v1317_v5 = vmul.f32 0.6931472, %v1826_v16  ;;  %1827 = vlog2.f32 %v1232_v17 }
 0x33d   : > { %v1359_v21 = vsub.f32 %v2318_v47, %v1307_v18  ;;  %v1244_v42 = vpop.xlane.xlu2 %1243 }
 0x33e   : > { %v1364_v4 = vsub.f32 %v2324_v37, %v1317_v5  ;;  %1829 = vlog2.f32 %v1244_v42 }
 0x33f   : > { %v1391_v27 = vpack.c.bf16 %v1359_v21, %v1359_v21 }
 0x340   : > { %v1396_v44 = vpack.c.bf16 %v1364_v4, %v1364_v4 }
 0x341   : > { %1424 = vst.msk [vmem:[%s2346_s30 + $0x2c] sm:$0xf] %vm1412_vm2, %v1391_v27 }
 0x342   : > { %v1828_v30 = vpop.eup %1827  ;;  %1429 = vst.msk [vmem:[%s2346_s30 + $0x40] sm:$0xf] %vm1412_vm2, %v1396_v44 }
 0x343   : > { %v1313_v29 = vmul.f32 0.6931472, %v1828_v30  ;;  %v1241_v41 = vpop.xlane.xlu1 %1240 }
 0x344   : > { %v1830_v14 = vpop.eup %1829  ;;  %1831 = vlog2.f32 %v1241_v41 }
 0x345   : > { %v1362_v45 = vsub.f32 %v2332_v36, %v1313_v29  ;;  %v1321_v47 = vmul.f32 0.6931472, %v1830_v14  ;;  %v1247_v49 = vpop.xlane.xlu0 %1246 }
 0x346   : > { %1833 = vlog2.f32 %v1247_v49 }
 0x347   : > { %v1394_v37 = vpack.c.bf16 %v1362_v45, %v1362_v45  ;;  %v1366_v6 = vsub.f32 %v2356_v23, %v1321_v47 }
 0x349   : > { %1427 = vst.msk [vmem:[%s2346_s30 + $0x38] sm:$0xf] %vm1412_vm2, %v1394_v37  ;;  %v1398_v33 = vpack.c.bf16 %v1366_v6, %v1366_v6 }
 0x34a   : > { %v1832_v39 = vpop.eup %1831 }
 0x34b   : > { %1431 = vst.msk [vmem:[%s2346_s30 + $0x48] sm:$0xf] %vm1412_vm2, %v1398_v33  ;;  %v1319_v56 = vmul.f32 0.6931472, %v1832_v39 }
 0x34c   : > { %v1834_v40 = vpop.eup %1833 }
 0x34d   : > { %v1365_v50 = vsub.f32 %v2353_v60, %v1319_v56  ;;  %v1323_v36 = vmul.f32 0.6931472, %v1834_v40  ;;  %v1250_v52 = vpop.xlane.xlu1 %1249 }
 0x34e   : > { %1835 = vlog2.f32 %v1250_v52 }
 0x34f   : > { %v1397_v46 = vpack.c.bf16 %v1365_v50, %v1365_v50  ;;  %v1367_v7 = vsub.f32 %v2366_v24, %v1323_v36 }
 0x351   : > { %1430 = vst.msk [vmem:[%s2346_s30 + $0x44] sm:$0xf] %vm1412_vm2, %v1397_v46  ;;  %v1399_v23 = vpack.c.bf16 %v1367_v7, %v1367_v7 }
 0x353   : > { %1432 = vst.msk [vmem:[%s2346_s30 + $0x4c] sm:$0xf] %vm1412_vm2, %v1399_v23 }
 0x354   : > { %v1836_v48 = vpop.eup %1835 }
 0x355   : > { %v1325_v19 = vmul.f32 0.6931472, %v1836_v48  ;;  %v1253_v61 = vpop.xlane.xlu2 %1252 }
 0x356   : > { %1837 = vlog2.f32 %v1253_v61 }
 0x357   : > { %v1368_v58 = vsub.f32 %v2375_v22, %v1325_v19 }
 0x359   : > { %v1400_v60 = vpack.c.bf16 %v1368_v58, %v1368_v58 }
 0x35b   : > { %1433 = vst.msk [vmem:[%s2346_s30 + $0x50] sm:$0xf] %vm1412_vm2, %v1400_v60 }
 0x35c   : > { %v1838_v11 = vpop.eup %1837 }
 0x35d   : > { %v1327_v63 = vmul.f32 0.6931472, %v1838_v11  ;;  %v1256_v43 = vpop.xlane.xlu0 %1255 }
 0x35e   : > { %1839 = vlog2.f32 %v1256_v43 }
 0x35f   : > { %v1369_v24 = vsub.f32 %v2384_v20, %v1327_v63 }
 0x361   : > { %v1401_v54 = vpack.c.bf16 %v1369_v24, %v1369_v24 }
 0x363   : > { %1434 = vst.msk [vmem:[%s2346_s30 + $0x54] sm:$0xf] %vm1412_vm2, %v1401_v54 }
 0x364   : > { %v1840_v55 = vpop.eup %1839 }
 0x365   : > { %v1329_v1 = vmul.f32 0.6931472, %v1840_v55  ;;  %v1259_v25 = vpop.xlane.xlu1 %1258 }
 0x366   : > { %1841 = vlog2.f32 %v1259_v25 }
 0x367   : > { %v1370_v22 = vsub.f32 %v2392_v53, %v1329_v1 }
 0x369   : > { %v1402_v26 = vpack.c.bf16 %v1370_v22, %v1370_v22 }
 0x36b   : > { %1435 = vst.msk [vmem:[%s2346_s30 + $0x58] sm:$0xf] %vm1412_vm2, %v1402_v26 }
 0x36c   : > { %v1842_v3 = vpop.eup %1841 }
 0x36d   : > { %v1331_v2 = vmul.f32 0.6931472, %v1842_v3 }
 0x36f   : > { %v1371_v10 = vsub.f32 %v2400_v0, %v1331_v2 }
 0x371   : > { %v1403_v59 = vpack.c.bf16 %v1371_v10, %v1371_v10 }
 0x373   : > { %1436 = vst.msk [vmem:[%s2346_s30 + $0x5c] sm:$0xf] %vm1412_vm2, %v1403_v59  ;;  %v1262_v20 = vpop.xlane.xlu2 %1261 }
 0x374   : > { %1843 = vlog2.f32 %v1262_v20 }
 0x37a   : > { %v1844_v8 = vpop.eup %1843 }
 0x37b   : > { %v1333_v31 = vmul.f32 0.6931472, %v1844_v8  ;;  %v1265_v13 = vpop.xlane.xlu0 %1264 }
 0x37c   : > { %1845 = vlog2.f32 %v1265_v13 }
 0x37d   : > { %v1372_v53 = vsub.f32 %v2412_v57, %v1333_v31 }
 0x37f   : > { %v1404_v12 = vpack.c.bf16 %v1372_v53, %v1372_v53 }
 0x381   : > { %1437 = vst.msk [vmem:[%s2346_s30 + $0x60] sm:$0xf] %vm1412_vm2, %v1404_v12 }
 0x382   : > { %v1846_v15 = vpop.eup %1845 }
 0x383   : > { %v1335_v32 = vmul.f32 0.6931472, %v1846_v15  ;;  %v1268_v16 = vpop.xlane.xlu1 %1267 }
 0x384   : > { %1847 = vlog2.f32 %v1268_v16 }
 0x385   : > { %v1373_v0 = vsub.f32 %v2419_v62, %v1335_v32 }
 0x387   : > { %v1405_v18 = vpack.c.bf16 %v1373_v0, %v1373_v0 }
 0x389   : > { %1438 = vst.msk [vmem:[%s2346_s30 + $0x64] sm:$0xf] %vm1412_vm2, %v1405_v18 }
 0x38a   : > { %v1848_v17 = vpop.eup %1847 }
 0x38b   : > { %v1337_v5 = vmul.f32 0.6931472, %v1848_v17  ;;  %v1271_v21 = vpop.xlane.xlu2 %1270 }
 0x38c   : > { %1849 = vlog2.f32 %v1271_v21 }
 0x38d   : > { %v1374_v57 = vsub.f32 %v2427_v38, %v1337_v5 }
 0x38f   : > { %v1406_v42 = vpack.c.bf16 %v1374_v57, %v1374_v57 }
 0x391   : > { %1439 = vst.msk [vmem:[%s2346_s30 + $0x68] sm:$0xf] %vm1412_vm2, %v1406_v42 }
 0x392   : > { %v1850_v4 = vpop.eup %1849 }
 0x393   : > { %v1339_v27 = vmul.f32 0.6931472, %v1850_v4  ;;  %v1274_v44 = vpop.xlane.xlu0 %1273 }
 0x394   : > { %1851 = vlog2.f32 %v1274_v44 }
 0x395   : > { %v1375_v62 = vsub.f32 %v2435_v34, %v1339_v27 }
 0x397   : > { %v1407_v30 = vpack.c.bf16 %v1375_v62, %v1375_v62 }
 0x399   : > { %1440 = vst.msk [vmem:[%s2346_s30 + $0x6c] sm:$0xf] %vm1412_vm2, %v1407_v30 }
 0x39a   : > { %v1852_v29 = vpop.eup %1851 }
 0x39b   : > { %v1341_v41 = vmul.f32 0.6931472, %v1852_v29  ;;  %v1277_v14 = vpop.xlane.xlu1 %1276 }
 0x39c   : > { %1853 = vlog2.f32 %v1277_v14 }
 0x39d   : > { %v1376_v38 = vsub.f32 %v2440_v28, %v1341_v41 }
 0x39f   : > { %v1408_v45 = vpack.c.bf16 %v1376_v38, %v1376_v38 }
 0x3a1   : > { %1441 = vst.msk [vmem:[%s2346_s30 + $0x70] sm:$0xf] %vm1412_vm2, %v1408_v45 }
 0x3a2   : > { %v1854_v47 = vpop.eup %1853 }
 0x3a3   : > { %v1343_v49 = vmul.f32 0.6931472, %v1854_v47  ;;  %v1280_v37 = vpop.xlane.xlu2 %1279 }
 0x3a4   : > { %1855 = vlog2.f32 %v1280_v37 }
 0x3a5   : > { %v1377_v34 = vsub.f32 %v2445_v35, %v1343_v49 }
 0x3a7   : > { %v1409_v6 = vpack.c.bf16 %v1377_v34, %v1377_v34 }
 0x3a9   : > { %1442 = vst.msk [vmem:[%s2346_s30 + $0x74] sm:$0xf] %vm1412_vm2, %v1409_v6 }
 0x3aa   : > { %v1856_v33 = vpop.eup %1855 }
 0x3ab   : > { %v1345_v39 = vmul.f32 0.6931472, %v1856_v33  ;;  %v1283_v56 = vpop.xlane.xlu0 %1282 }
 0x3ac   : > { %1857 = vlog2.f32 %v1283_v56 }
 0x3ad   : > { %v1378_v28 = vsub.f32 %v2450_v9, %v1345_v39 }
 0x3af   : > { %v1410_v40 = vpack.c.bf16 %v1378_v28, %v1378_v28 }
 0x3b1   : > { %1443 = vst.msk [vmem:[%s2346_s30 + $0x78] sm:$0xf] %vm1412_vm2, %v1410_v40 }
 0x3b2   : > { %v1858_v50 = vpop.eup %1857 }
 0x3b3   : > { %v1347_v36 = vmul.f32 0.6931472, %v1858_v50 }
 0x3b5   : > { %v1379_v52 = vsub.f32 %v2455_v51, %v1347_v36 }
 0x3b7   : > { %v1411_v46 = vpack.c.bf16 %v1379_v52, %v1379_v52 }
 0x3b9   : > { %1444 = vst.msk [vmem:[%s2346_s30 + $0x7c] sm:$0xf] %vm1412_vm2, %v1411_v46 }
 0x3ba PF: > { %s17_s24 = sadd.s32 1, %s1865_s24  }
 0x3bb   : > { %p14_p4 = scmp.ge.s32.totalorder %s17_s24, 6  }
 0x3bd   :  { %16 = sbr.rel (!%p14_p4) target bundleno = 1 (0x1), region = 78 }

</bundles_post_ra>
